<compile_context>
chip_gen: v6e
topology: v6e:2x2x1
jax: 0.10.0
libtpu: 0.0.40
codegen_flags: <defaults>
</compile_context>

<pallas_src>
import numpy as np

import jax
import jax.numpy as jnp
from jax.experimental import pallas as pl
from jax.experimental.pallas import tpu as pltpu


# ----------------------------------------------------------------------------
# Pallas kernels
# ----------------------------------------------------------------------------
def _make_layer_kernel(K, H, alpha, inv_L, la_feature):
    """Build the per-layer kernel; K/H/alpha/inv_L/la_feature are static."""

    def kernel(x_ref, z_ref, lmat_ref, lpow_ref, *rest):
        # x_ref   : (T, Tb, C)  time-chunk of the time-major input sequence
        # z_ref   : (C, K*H)    flattened anchor k-mers, bf16
        # lmat_ref: (T, T)      lower-triangular lam-power scan matrix
        # lpow_ref: (T, 1)      lam^(t+1) (carry contribution)
        # [lt_ref]: (H, H)      Nystrom lintrans (last layer only)
        # seq_ref : (T, Tb, H)  per-position features c_K[t]
        # pooled  : (Tb, H)     mean-pooled (optionally lintrans-projected)
        # hid_ref : (Tb, K, H)  final hidden state
        # c_scr   : (Tb, K, H)  recurrent carry (persists across time chunks)
        # acc_scr : (Tb, H)     pooling accumulator
        if la_feature:
            lt_ref = rest[0]
            seq_ref, pooled_ref, hid_ref, c_scr, acc_scr = rest[1:]
        else:
            seq_ref, pooled_ref, hid_ref, c_scr, acc_scr = rest

        T, Tb, C = x_ref.shape
        ti = pl.program_id(1)

        @pl.when(ti == 0)
        def _():
            c_scr[...] = jnp.zeros_like(c_scr)      # initial hidden state = 0
            acc_scr[...] = jnp.zeros_like(acc_scr)

        # ---- (1) fused kernel embedding on the MXU: b = exp(alpha*(x.z - 1))
        x2d = x_ref[...].reshape(T * Tb, C).astype(jnp.bfloat16)
        s = jnp.dot(x2d, z_ref[...], preferred_element_type=jnp.float32)
        b = jnp.exp(alpha * (s - 1.0)).reshape(T, Tb, K * H)

        # ---- (2) chunked affine scan over the time chunk (per k-mer slot j):
        #      c_j[t] = lam^(t+1)*c_j[-1] + sum_{s<=t} lam^(t-s)*b_j[s]*c_{j-1}[s-1]
        old_c = c_scr[...]                          # carry from previous chunk
        lmat = lmat_ref[...]                        # (T, T)
        lpow = lpow_ref[...].reshape(T, 1, 1)       # lam^(t+1)

        traj = None
        for j in range(K):                          # K is small and static
            b_j = b[:, :, j * H:(j + 1) * H]        # (T, Tb, H)
            if j == 0:
                u = b_j                             # c_0 == 1 at every position
            else:
                if T > 1:
                    prev = jnp.concatenate(
                        [old_c[:, j - 1, :][None], traj[:T - 1]], axis=0)
                else:
                    prev = old_c[:, j - 1, :][None]
                u = b_j * prev
            scan = jnp.dot(lmat, u.reshape(T, Tb * H),
                           preferred_element_type=jnp.float32).reshape(T, Tb, H)
            traj = scan + lpow * old_c[:, j, :][None]
            c_scr[:, j, :] = traj[T - 1]            # new carry for slot j

        seq_ref[...] = traj                         # c_K over this chunk
        acc_scr[...] += jnp.sum(traj, axis=0)

        # ---- (3) finalize: mean pooling (+ Nystrom projection on last layer)
        @pl.when(ti == pl.num_programs(1) - 1)
        def _():
            pooled = acc_scr[...] * inv_L
            if la_feature:
                pooled = jnp.dot(pooled, lt_ref[...],
                                 preferred_element_type=jnp.float32)
            pooled_ref[...] = pooled
            hid_ref[...] = c_scr[...]

    return kernel


def _linear_kernel(x_ref, w_ref, b_ref, o_ref):
    # x: (B, D), w: (D, n_classes), b: (1, n_classes) -> o: (B, n_classes)
    o_ref[...] = (jnp.dot(x_ref[...], w_ref[...],
                          preferred_element_type=jnp.float32) + b_ref[...])


# ----------------------------------------------------------------------------
# Wrappers
# ----------------------------------------------------------------------------
_VMEM = pl.BlockSpec(memory_space=pltpu.MemorySpace.VMEM)


def _largest_divisor_leq(n, cap):
    for t in range(min(n, cap), 0, -1):
        if n % t == 0:
            return t
    return n


def _choose_batch_block(B):
    # split batch into 2 blocks (v7x megacore) when the sublane rule allows it
    return B // 2 if (B % 16 == 0) else B


def _scan_matrices(lam, T):
    idx = np.arange(T)
    diff = idx[:, None] - idx[None, :]
    lmat = np.where(diff >= 0, float(lam) ** np.maximum(diff, 0), 0.0)
    lpow = (float(lam) ** (idx + 1)).reshape(T, 1)
    return jnp.asarray(lmat, jnp.float32), jnp.asarray(lpow, jnp.float32)


def rkn_layer_forward(x_lbc, params, la_feature):
    """One RKN layer. x_lbc: (L, B, C) time-major.
    Returns (pooled (B,H), seq (L,B,H), hidden (B,K,H))."""
    L, B, C = x_lbc.shape
    K = params["kmer_size"]
    H = params["hidden_size"]
    alpha = params["alpha"]              # python float (non-trainable default)
    lam = params["gap_penalty"]          # python float (non-trainable default)

    T = _largest_divisor_leq(L, 128)     # time-chunk size (bounds VMEM)
    Tb = _choose_batch_block(B)
    lmat, lpow = _scan_matrices(lam, T)

    kernel = _make_layer_kernel(K, H, alpha, 1.0 / L, la_feature)

    inputs = [x_lbc, params["z_flat"], lmat, lpow]
    in_specs = [
        pl.BlockSpec((T, Tb, C), lambda bi, ti: (ti, bi, 0)),
        pl.BlockSpec((C, K * H), lambda bi, ti: (0, 0)),
        pl.BlockSpec((T, T), lambda bi, ti: (0, 0)),
        pl.BlockSpec((T, 1), lambda bi, ti: (0, 0)),
    ]
    if la_feature:
        inputs.append(params["lintrans"])
        in_specs.append(pl.BlockSpec((H, H), lambda bi, ti: (0, 0)))

    out_shape = (
        jax.ShapeDtypeStruct((L, B, H), jnp.float32),   # seq (time-major)
        jax.ShapeDtypeStruct((B, H), jnp.float32),      # pooled
        jax.ShapeDtypeStruct((B, K, H), jnp.float32),   # hidden
    )
    out_specs = (
        pl.BlockSpec((T, Tb, H), lambda bi, ti: (ti, bi, 0)),
        pl.BlockSpec((Tb, H), lambda bi, ti: (bi, 0)),
        pl.BlockSpec((Tb, K, H), lambda bi, ti: (bi, 0, 0)),
    )

    flops = (2 * L * B * C * K * H            # embedding matmul
             + 2 * K * L * T * B * H          # chunked-scan matmuls
             + (2 * B * H * H if la_feature else 0))
    cost = pl.CostEstimate(
        flops=int(flops),
        transcendentals=int(L * B * K * H),
        bytes_accessed=int(4 * (L * B * C + L * B * H + B * K * H + B * H)
                           + 2 * C * K * H + 4 * (T * T + T)),
    )

    seq, pooled, hid = pl.pallas_call(
        kernel,
        grid=(B // Tb, L // T),
        in_specs=in_specs,
        out_specs=out_specs,
        out_shape=out_shape,
        scratch_shapes=[
            pltpu.VMEM((Tb, K, H), jnp.float32),   # recurrent carry
            pltpu.VMEM((Tb, H), jnp.float32),      # pooling accumulator
        ],
        compiler_params=pltpu.CompilerParams(
            dimension_semantics=("parallel", "arbitrary"),
            vmem_limit_bytes=48 * 1024 * 1024,
        ),
        cost_estimate=cost,
    )(*inputs)
    return pooled, seq, hid


def linear_forward(x, clf_params):
    w_t = clf_params["weight_t"]                 # (D, n_classes)
    b = clf_params["bias"]                       # (1, n_classes)
    B = x.shape[0]
    n_classes = w_t.shape[1]
    return pl.pallas_call(
        _linear_kernel,
        out_shape=jax.ShapeDtypeStruct((B, n_classes), jnp.float32),
        in_specs=[_VMEM, _VMEM, _VMEM],
        out_specs=_VMEM,
    )(x, w_t, b)


def rkn_forward(x_ncl, layer_params_list, clf_params):
    """RKN.forward(input) -> (classifier(output), hidden_list)."""
    # single layout change at the API boundary: NCL (B,C,L) -> time-major (L,B,C)
    seq = jnp.transpose(x_ncl, (2, 0, 1)).astype(jnp.float32)
    hiddens = []
    n_layers = len(layer_params_list)
    pooled = None
    for i, p in enumerate(layer_params_list):
        # default la_features=None => la_feature only on the last layer
        la_feature = (i == n_layers - 1)
        pooled, seq, hid = rkn_layer_forward(seq, p, la_feature)
        hiddens.append(hid)
    logits = linear_forward(pooled, clf_params)
    return logits, hiddens


# ----------------------------------------------------------------------------
# Deterministic parameter initialization (synthetic, no checkpoint)
# ----------------------------------------------------------------------------
def _inv_sqrt(mat, eps=1e-5):
    w, v = jnp.linalg.eigh(mat)
    w = jnp.maximum(w, eps)
    return (v * (1.0 / jnp.sqrt(w))) @ v.T


def init_layer_params(key, input_size, hidden_size, kmer_size,
                      gap_penalty=0.5, sigma=0.5):
    z = jax.random.normal(key, (kmer_size, input_size, hidden_size), jnp.float32)
    z = z / jnp.maximum(jnp.linalg.norm(z, axis=1, keepdims=True), 1e-6)
    alpha = 1.0 / (sigma ** 2)
    # Nystrom projection matrix kappa(Z^T Z)^{-1/2} over anchor k-mers
    gram = jnp.exp(alpha * (jnp.einsum("kci,kcj->ij", z, z) - kmer_size))
    lintrans = _inv_sqrt(gram)
    # pre-flattened anchors for the single fused embedding matmul:
    # z_flat[c, k*H + h] = z[k, c, h], stored bf16 (MXU-native)
    z_flat = jnp.transpose(z, (1, 0, 2)).reshape(input_size,
                                                 kmer_size * hidden_size)
    return dict(z_flat=z_flat.astype(jnp.bfloat16),
                lintrans=lintrans.astype(jnp.float32),
                hidden_size=hidden_size,
                kmer_size=kmer_size,
                gap_penalty=float(gap_penalty),   # non-trainable default
                alpha=float(alpha))               # non-trainable default


def init_rkn_params(key, input_size, hidden_sizes, kmer_sizes, n_classes):
    layer_params = []
    in_size = input_size
    keys = jax.random.split(key, len(hidden_sizes) + 1)
    for i, (h, k) in enumerate(zip(hidden_sizes, kmer_sizes)):
        layer_params.append(init_layer_params(keys[i], in_size, h, k))
        in_size = h
    output_size = hidden_sizes[-1]   # aggregations=None => output_size = hidden_sizes[-1]
    w = 0.1 * jax.random.normal(keys[-1], (n_classes, output_size), jnp.float32)
    clf = dict(weight_t=jnp.transpose(w),
               bias=jnp.zeros((1, n_classes), jnp.float32))
    return layer_params, clf


# ----------------------------------------------------------------------------
if __name__ == "__main__":
    key = jax.random.PRNGKey(0)
    k_data, k_params = jax.random.split(key)

    # small shapes: batch=2, input alphabet size=4 (one-hot), sequence length=16
    B, C, L = 2, 4, 16
    hidden_sizes = [16, 32]
    kmer_sizes = [2, 3]
    n_classes = 3

    idx = jax.random.randint(k_data, (B, L), 0, C)
    x = jax.nn.one_hot(idx, C, dtype=jnp.float32)     # (B, L, C)
    x = jnp.transpose(x, (0, 2, 1))                   # (B, C, L)  NCL layout

    layer_params, clf_params = init_rkn_params(k_params, C, hidden_sizes,
                                               kmer_sizes, n_classes)

    logits, hiddens = rkn_forward(x, layer_params, clf_params)
    jax.block_until_ready(logits)
    for h in hiddens:
        jax.block_until_ready(h)

    assert logits.shape == (B, n_classes)
    assert hiddens[-1].shape == (B, kmer_sizes[-1], hidden_sizes[-1])
    assert bool(jnp.all(jnp.isfinite(logits)))
    print("KERNEL_OK")
</pallas_src>

<mosaic_0001>
module attributes {stable_mosaic.version = 11 : i64} {
  func.func @kernel(%arg0: i32, %arg1: i32, %arg2: memref<16x2x4xf32, #tpu.memory_space<vmem>>, %arg3: memref<4x32xbf16, #tpu.memory_space<vmem>>, %arg4: memref<16x16xf32, #tpu.memory_space<vmem>>, %arg5: memref<16x1xf32, #tpu.memory_space<vmem>>, %arg6: memref<16x2x16xf32, #tpu.memory_space<vmem>>, %arg7: memref<2x16xf32, #tpu.memory_space<vmem>>, %arg8: memref<2x2x16xf32, #tpu.memory_space<vmem>>, %arg9: memref<2x2x16xf32, #tpu.memory_space<vmem>>, %arg10: memref<2x16xf32, #tpu.memory_space<vmem>>) attributes {dimension_semantics = [#tpu.dimension_semantics<parallel>, #tpu.dimension_semantics<arbitrary>], iteration_bounds = array<i64: 1, 1>, scalar_prefetch = 0 : i64, scratch_operands = 2 : i64, tpu.core_type = #tpu.core_type<tc>, window_params = [{transform_indices = @transform_0, window_bounds = array<i64: 16, 2, 4>}, {pipeline_mode = #tpu.pipeline_mode<synchronous>, transform_indices = @transform_1, window_bounds = array<i64: 4, 32>}, {pipeline_mode = #tpu.pipeline_mode<synchronous>, transform_indices = @transform_2, window_bounds = array<i64: 16, 16>}, {pipeline_mode = #tpu.pipeline_mode<synchronous>, transform_indices = @transform_3, window_bounds = array<i64: 16, 1>}, {transform_indices = @transform_4, window_bounds = array<i64: 16, 2, 16>}, {transform_indices = @transform_5, window_bounds = array<i64: 2, 16>}, {transform_indices = @transform_6, window_bounds = array<i64: 2, 2, 16>}]} {
    %c0_i32 = arith.constant 0 : i32
    %0 = arith.cmpi eq, %arg1, %c0_i32 : i32
    %1 = arith.extui %0 : i1 to i32
    %c0_i32_0 = arith.constant 0 : i32
    %2 = arith.cmpi ne, %1, %c0_i32_0 : i32
    scf.if %2 {
      %cst_31 = arith.constant 0.000000e+00 : f32
      %64 = vector.broadcast %cst_31 : f32 to vector<2x2x16xf32>
      %c0_32 = arith.constant 0 : index
      %c0_33 = arith.constant 0 : index
      %c0_34 = arith.constant 0 : index
      %65 = vector.load %arg9[%c0_32, %c0_33, %c0_34] : memref<2x2x16xf32, #tpu.memory_space<vmem>>, vector<2x2x16xf32>
      tpu.vector_store %arg9[%c0_32, %c0_33, %c0_34], %64 {strides = array<i32>} : memref<2x2x16xf32, #tpu.memory_space<vmem>>, vector<2x2x16xf32>,
      %cst_35 = arith.constant 0.000000e+00 : f32
      %66 = vector.broadcast %cst_35 : f32 to vector<2x16xf32>
      %c0_36 = arith.constant 0 : index
      %c0_37 = arith.constant 0 : index
      %67 = vector.load %arg10[%c0_36, %c0_37] : memref<2x16xf32, #tpu.memory_space<vmem>>, vector<2x16xf32>
      tpu.vector_store %arg10[%c0_36, %c0_37], %66 {strides = array<i32>} : memref<2x16xf32, #tpu.memory_space<vmem>>, vector<2x16xf32>,
    } else {
    }
    %c0 = arith.constant 0 : index
    %c0_1 = arith.constant 0 : index
    %c0_2 = arith.constant 0 : index
    %3 = vector.load %arg2[%c0, %c0_1, %c0_2] : memref<16x2x4xf32, #tpu.memory_space<vmem>>, vector<16x2x4xf32>
    %4 = vector.shape_cast %3 : vector<16x2x4xf32> to vector<32x4xf32>
    %5 = arith.truncf %4 : vector<32x4xf32> to vector<32x4xbf16>
    %c0_3 = arith.constant 0 : index
    %c0_4 = arith.constant 0 : index
    %6 = vector.load %arg3[%c0_3, %c0_4] : memref<4x32xbf16, #tpu.memory_space<vmem>>, vector<4x32xbf16>
    %cst = arith.constant dense<0.000000e+00> : vector<32x32xf32>
    %7 = tpu.matmul %5, %6, %cst {dimension_numbers = #tpu.dot_dimension_numbers<[1], [0], [0], [1], [0, 0, 1, 1], [], []>} : vector<32x4xbf16>, vector<4x32xbf16>, vector<32x32xf32> -> vector<32x32xf32>
    %cst_5 = arith.constant 1.000000e+00 : f32
    %8 = vector.broadcast %cst_5 : f32 to vector<32x32xf32>
    %9 = arith.subf %7, %8 : vector<32x32xf32>
    %cst_6 = arith.constant 4.000000e+00 : f32
    %10 = vector.broadcast %cst_6 : f32 to vector<32x32xf32>
    %11 = arith.mulf %10, %9 : vector<32x32xf32>
    %12 = math.exp %11 : vector<32x32xf32>
    %13 = vector.shape_cast %12 : vector<32x32xf32> to vector<16x2x32xf32>
    %c0_7 = arith.constant 0 : index
    %c0_8 = arith.constant 0 : index
    %c0_9 = arith.constant 0 : index
    %14 = vector.load %arg9[%c0_7, %c0_8, %c0_9] : memref<2x2x16xf32, #tpu.memory_space<vmem>>, vector<2x2x16xf32>
    %c0_10 = arith.constant 0 : index
    %c0_11 = arith.constant 0 : index
    %15 = vector.load %arg4[%c0_10, %c0_11] : memref<16x16xf32, #tpu.memory_space<vmem>>, vector<16x16xf32>
    %c0_12 = arith.constant 0 : index
    %c0_13 = arith.constant 0 : index
    %16 = vector.load %arg5[%c0_12, %c0_13] : memref<16x1xf32, #tpu.memory_space<vmem>>, vector<16x1xf32>
    %17 = vector.shape_cast %16 : vector<16x1xf32> to vector<16x1x1xf32>
    %18 = vector.extract_strided_slice %13 {offsets = [0, 0, 0], sizes = [16, 2, 16], strides = [1, 1, 1]} : vector<16x2x32xf32> to vector<16x2x16xf32>
    %19 = vector.shape_cast %18 : vector<16x2x16xf32> to vector<16x32xf32>
    %cst_14 = arith.constant dense<0.000000e+00> : vector<16x32xf32>
    %20 = tpu.matmul %15, %19, %cst_14 {dimension_numbers = #tpu.dot_dimension_numbers<[1], [0], [0], [1], [0, 0, 1, 1], [], []>} : vector<16x16xf32>, vector<16x32xf32>, vector<16x32xf32> -> vector<16x32xf32>
    %21 = vector.shape_cast %20 : vector<16x32xf32> to vector<16x2x16xf32>
    %22 = vector.extract_strided_slice %14 {offsets = [0, 0, 0], sizes = [2, 1, 16], strides = [1, 1, 1]} : vector<2x2x16xf32> to vector<2x1x16xf32>
    %23 = vector.shape_cast %22 : vector<2x1x16xf32> to vector<2x16xf32>
    %24 = vector.shape_cast %23 : vector<2x16xf32> to vector<1x2x16xf32>
    %25 = vector.broadcast %17 : vector<16x1x1xf32> to vector<16x2x16xf32>
    %26 = vector.broadcast %24 : vector<1x2x16xf32> to vector<16x2x16xf32>
    %27 = arith.mulf %25, %26 : vector<16x2x16xf32>
    %28 = arith.addf %21, %27 : vector<16x2x16xf32>
    %29 = vector.extract_strided_slice %28 {offsets = [15, 0, 0], sizes = [1, 2, 16], strides = [1, 1, 1]} : vector<16x2x16xf32> to vector<1x2x16xf32>
    %30 = vector.shape_cast %29 : vector<1x2x16xf32> to vector<2x16xf32>
    %c0_15 = arith.constant 0 : index
    %c0_16 = arith.constant 0 : index
    %c0_17 = arith.constant 0 : index
    %31 = vector.load %arg9[%c0_15, %c0_16, %c0_17] : memref<2x2x16xf32, #tpu.memory_space<vmem>>, vector<2x1x16xf32>
    %32 = vector.shape_cast %31 : vector<2x1x16xf32> to vector<2x16xf32>
    %33 = vector.shape_cast %30 : vector<2x16xf32> to vector<2x1x16xf32>
    tpu.vector_store %arg9[%c0_15, %c0_16, %c0_17], %33 {strides = array<i32>} : memref<2x2x16xf32, #tpu.memory_space<vmem>>, vector<2x1x16xf32>,
    %34 = vector.extract_strided_slice %13 {offsets = [0, 0, 16], sizes = [16, 2, 16], strides = [1, 1, 1]} : vector<16x2x32xf32> to vector<16x2x16xf32>
    %35 = vector.extract_strided_slice %14 {offsets = [0, 0, 0], sizes = [2, 1, 16], strides = [1, 1, 1]} : vector<2x2x16xf32> to vector<2x1x16xf32>
    %36 = vector.shape_cast %35 : vector<2x1x16xf32> to vector<2x16xf32>
    %37 = vector.shape_cast %36 : vector<2x16xf32> to vector<1x2x16xf32>
    %38 = vector.extract_strided_slice %28 {offsets = [0, 0, 0], sizes = [15, 2, 16], strides = [1, 1, 1]} : vector<16x2x16xf32> to vector<15x2x16xf32>
    %39 = tpu.concatenate %37, %38 in 0 : vector<1x2x16xf32>, vector<15x2x16xf32> -> vector<16x2x16xf32>
    %40 = arith.mulf %34, %39 : vector<16x2x16xf32>
    %41 = vector.shape_cast %40 : vector<16x2x16xf32> to vector<16x32xf32>
    %cst_18 = arith.constant dense<0.000000e+00> : vector<16x32xf32>
    %42 = tpu.matmul %15, %41, %cst_18 {dimension_numbers = #tpu.dot_dimension_numbers<[1], [0], [0], [1], [0, 0, 1, 1], [], []>} : vector<16x16xf32>, vector<16x32xf32>, vector<16x32xf32> -> vector<16x32xf32>
    %43 = vector.shape_cast %42 : vector<16x32xf32> to vector<16x2x16xf32>
    %44 = vector.extract_strided_slice %14 {offsets = [0, 1, 0], sizes = [2, 1, 16], strides = [1, 1, 1]} : vector<2x2x16xf32> to vector<2x1x16xf32>
    %45 = vector.shape_cast %44 : vector<2x1x16xf32> to vector<2x16xf32>
    %46 = vector.shape_cast %45 : vector<2x16xf32> to vector<1x2x16xf32>
    %47 = vector.broadcast %17 : vector<16x1x1xf32> to vector<16x2x16xf32>
    %48 = vector.broadcast %46 : vector<1x2x16xf32> to vector<16x2x16xf32>
    %49 = arith.mulf %47, %48 : vector<16x2x16xf32>
    %50 = arith.addf %43, %49 : vector<16x2x16xf32>
    %51 = vector.extract_strided_slice %50 {offsets = [15, 0, 0], sizes = [1, 2, 16], strides = [1, 1, 1]} : vector<16x2x16xf32> to vector<1x2x16xf32>
    %52 = vector.shape_cast %51 : vector<1x2x16xf32> to vector<2x16xf32>
    %c0_19 = arith.constant 0 : index
    %c1 = arith.constant 1 : index
    %c0_20 = arith.constant 0 : index
    %53 = vector.load %arg9[%c0_19, %c1, %c0_20] : memref<2x2x16xf32, #tpu.memory_space<vmem>>, vector<2x1x16xf32>
    %54 = vector.shape_cast %53 : vector<2x1x16xf32> to vector<2x16xf32>
    %55 = vector.shape_cast %52 : vector<2x16xf32> to vector<2x1x16xf32>
    tpu.vector_store %arg9[%c0_19, %c1, %c0_20], %55 {strides = array<i32>} : memref<2x2x16xf32, #tpu.memory_space<vmem>>, vector<2x1x16xf32>,
    %c0_21 = arith.constant 0 : index
    %c0_22 = arith.constant 0 : index
    %c0_23 = arith.constant 0 : index
    %56 = vector.load %arg6[%c0_21, %c0_22, %c0_23] : memref<16x2x16xf32, #tpu.memory_space<vmem>>, vector<16x2x16xf32>
    tpu.vector_store %arg6[%c0_21, %c0_22, %c0_23], %50 {strides = array<i32>} : memref<16x2x16xf32, #tpu.memory_space<vmem>>, vector<16x2x16xf32>,
    %c0_24 = arith.constant 0 : index
    %c0_25 = arith.constant 0 : index
    %57 = vector.load %arg10[%c0_24, %c0_25] : memref<2x16xf32, #tpu.memory_space<vmem>>, vector<2x16xf32>
    %cst_26 = arith.constant dense<0.000000e+00> : vector<2x16xf32>
    %58 = vector.multi_reduction <add>, %50, %cst_26 [0] : vector<16x2x16xf32> to vector<2x16xf32>
    %59 = arith.addf %57, %58 : vector<2x16xf32>
    %c0_27 = arith.constant 0 : index
    %c0_28 = arith.constant 0 : index
    %60 = vector.load %arg10[%c0_27, %c0_28] : memref<2x16xf32, #tpu.memory_space<vmem>>, vector<2x16xf32>
    tpu.vector_store %arg10[%c0_27, %c0_28], %59 {strides = array<i32>} : memref<2x16xf32, #tpu.memory_space<vmem>>, vector<2x16xf32>,
    %c0_i32_29 = arith.constant 0 : i32
    %61 = arith.cmpi eq, %arg1, %c0_i32_29 : i32
    %62 = arith.extui %61 : i1 to i32
    %c0_i32_30 = arith.constant 0 : i32
    %63 = arith.cmpi ne, %62, %c0_i32_30 : i32
    scf.if %63 {
      %c0_31 = arith.constant 0 : index
      %c0_32 = arith.constant 0 : index
      %64 = vector.load %arg10[%c0_31, %c0_32] : memref<2x16xf32, #tpu.memory_space<vmem>>, vector<2x16xf32>
      %cst_33 = arith.constant 6.250000e-02 : f32
      %65 = vector.broadcast %cst_33 : f32 to vector<2x16xf32>
      %66 = arith.mulf %64, %65 : vector<2x16xf32>
      %c0_34 = arith.constant 0 : index
      %c0_35 = arith.constant 0 : index
      %67 = vector.load %arg7[%c0_34, %c0_35] : memref<2x16xf32, #tpu.memory_space<vmem>>, vector<2x16xf32>
      tpu.vector_store %arg7[%c0_34, %c0_35], %66 {strides = array<i32>} : memref<2x16xf32, #tpu.memory_space<vmem>>, vector<2x16xf32>,
      %c0_36 = arith.constant 0 : index
      %c0_37 = arith.constant 0 : index
      %c0_38 = arith.constant 0 : index
      %68 = vector.load %arg9[%c0_36, %c0_37, %c0_38] : memref<2x2x16xf32, #tpu.memory_space<vmem>>, vector<2x2x16xf32>
      %c0_39 = arith.constant 0 : index
      %c0_40 = arith.constant 0 : index
      %c0_41 = arith.constant 0 : index
      %69 = vector.load %arg8[%c0_39, %c0_40, %c0_41] : memref<2x2x16xf32, #tpu.memory_space<vmem>>, vector<2x2x16xf32>
      tpu.vector_store %arg8[%c0_39, %c0_40, %c0_41], %68 {strides = array<i32>} : memref<2x2x16xf32, #tpu.memory_space<vmem>>, vector<2x2x16xf32>,
    } else {
    }
    return
  }
  func.func @transform_0(%arg0: i32, %arg1: i32) -> (i32, i32, i32) {
    %c0_i32 = arith.constant 0 : i32
    %c0_i32_0 = arith.constant 0 : i32
    return %arg1, %arg0, %c0_i32 : i32, i32, i32
  }
  func.func @transform_1(%arg0: i32, %arg1: i32) -> (i32, i32) {
    %c0_i32 = arith.constant 0 : i32
    %c0_i32_0 = arith.constant 0 : i32
    %c0_i32_1 = arith.constant 0 : i32
    return %c0_i32, %c0_i32_0 : i32, i32
  }
  func.func @transform_2(%arg0: i32, %arg1: i32) -> (i32, i32) {
    %c0_i32 = arith.constant 0 : i32
    %c0_i32_0 = arith.constant 0 : i32
    %c0_i32_1 = arith.constant 0 : i32
    return %c0_i32, %c0_i32_0 : i32, i32
  }
  func.func @transform_3(%arg0: i32, %arg1: i32) -> (i32, i32) {
    %c0_i32 = arith.constant 0 : i32
    %c0_i32_0 = arith.constant 0 : i32
    %c0_i32_1 = arith.constant 0 : i32
    return %c0_i32, %c0_i32_0 : i32, i32
  }
  func.func @transform_4(%arg0: i32, %arg1: i32) -> (i32, i32, i32) {
    %c0_i32 = arith.constant 0 : i32
    %c0_i32_0 = arith.constant 0 : i32
    return %arg1, %arg0, %c0_i32 : i32, i32, i32
  }
  func.func @transform_5(%arg0: i32, %arg1: i32) -> (i32, i32) {
    %c0_i32 = arith.constant 0 : i32
    %c0_i32_0 = arith.constant 0 : i32
    return %arg0, %c0_i32 : i32, i32
  }
  func.func @transform_6(%arg0: i32, %arg1: i32) -> (i32, i32, i32) {
    %c0_i32 = arith.constant 0 : i32
    %c0_i32_0 = arith.constant 0 : i32
    %c0_i32_1 = arith.constant 0 : i32
    return %arg0, %c0_i32, %c0_i32_0 : i32, i32, i32
  }
}

</mosaic_0001>

<bundles_post_ra>
// kernel: tpu_custom_call.1
= control target key start
LH: loop header
LB: loop body
LE: loop exit
PB: predicated region body
PF: predicated region fallthrough
CT: control target
= control target key end

     0   :  { %12 = vsyncpa [#allocation5], 0  ;;  %vm145_vm0 = vcmask 1041408   ;;  %v68_v2 = vlaneseq  ;;  %v2300_v11 = vmov 1983009808   ;;  %s3207_s0 = inlined_call_operand.vmem [shape: f32[16,2,4], index: 0, kind: input, shape index: {}]   ;;  %s3208_s1 = inlined_call_operand.vmem [shape: bf16[4,32], index: 1, kind: input, shape index: {}]   ;;  %s3209_s2 = inlined_call_operand.vmem [shape: f32[16,16], index: 2, kind: input, shape index: {}]   ;;  %s3210_s3 = inlined_call_operand.vmem [shape: f32[16,1], index: 3, kind: input, shape index: {}]   ;;  %s3211_s4 = inlined_call_operand.hbm [shape: f32[16,2,16], index: 4, kind: output, shape index: {0}]   ;;  %s3212_s5 = inlined_call_operand.hbm [shape: f32[2,16], index: 5, kind: output, shape index: {1}]   ;;  %s3213_s6 = inlined_call_operand.hbm [shape: f32[2,2,16], index: 6, kind: output, shape index: {2}]  }
   0x1   :  { %v137_v0 = vld [vmem:[%s3208_s1] sm:$0x3]  ;;  %v32_v4 = vld [vmem:[%s3207_s0 + $0x2] sm:$0x3]  ;;  %v33_v5 = vld [vmem:[%s3207_s0 + $0x4] sm:$0x3]  ;;  %v66_v12 = vunpack.c.l.s4 %v2300_v11 }
   0x2   :  { %v31_v1 = vld [vmem:[%s3207_s0] sm:$0x3]  ;;  %2209 = vmatprep.subr.msk.bf16.mxu0 %vm145_vm0, %v137_v0  ;;  %v147_v3 = vsel %vm145_vm0, %v137_v0, 0  ;;  %v34_v6 = vld [vmem:[%s3207_s0 + $0x6] sm:$0x3]  ;;  %v2374_v13 = vshrl.u32 %v68_v2, 7 }
   0x3   :  { %2190 = vmatpush3.bf16.msra.mxu0 %v147_v3  ;;  %v35_v7 = vld [vmem:[%s3207_s0 + $0x8] sm:$0x3]  ;;  %v36_v8 = vld [vmem:[%s3207_s0 + $0xa] sm:$0x3]  ;;  %v37_v9 = vld [vmem:[%s3207_s0 + $0xc] sm:$0x3]  ;;  %v63_v16 = vcombine.low %v31_v1, %v32_v4  ;;  %v64_v20 = vcombine.low %v33_v5, %v34_v6  ;;  %v67_v21 = vunpack.c.0.s8 %v66_v12 }
   0x4   :  { %v38_v10 = vld [vmem:[%s3207_s0 + $0xe] sm:$0x3]  ;;  %v39_v14 = vld [vmem:[%s3207_s0 + $0x10] sm:$0x3]  ;;  %v40_v15 = vld [vmem:[%s3207_s0 + $0x12] sm:$0x3]  ;;  %v80_v22 = vcombine.low %v35_v7, %v36_v8 }
   0x5   :  { %v41_v17 = vld [vmem:[%s3207_s0 + $0x14] sm:$0x3]  ;;  %v42_v18 = vld [vmem:[%s3207_s0 + $0x16] sm:$0x3]  ;;  %v43_v19 = vld [vmem:[%s3207_s0 + $0x18] sm:$0x3]  ;;  %v81_v23 = vcombine.low %v37_v9, %v38_v10  ;;  %v97_v27 = vcombine.low %v39_v14, %v40_v15 }
   0x6   :  { %v44_v24 = vld [vmem:[%s3207_s0 + $0x1a] sm:$0x3]  ;;  %v45_v25 = vld [vmem:[%s3207_s0 + $0x1c] sm:$0x3]  ;;  %v46_v26 = vld [vmem:[%s3207_s0 + $0x1e] sm:$0x3]  ;;  %v98_v28 = vcombine.low %v41_v17, %v42_v18 }
   0x7   :  { %v114_v29 = vcombine.low %v43_v19, %v44_v24  ;;  %v115_v30 = vcombine.low %v45_v25, %v46_v26 }
   0x8   :  { %13 = vsyncpa [#allocation7], 0  ;;  %v2401_v31 = vsub.s32 %v67_v21, %v2374_v13  ;;  %vm138_vm1 = vcmask 31744   ;;  %v2301_v46 = vmov 0   ;;  %vm27_vm2 = vcmask 123904   ;;  %v2420_v5 = vld [vmem:[%s3210_s3] sm:$0xff] }
   0x9   :  { %2222 = vset.pattern.permute.xlu0 %v2301_v46  ;;  %2223 = vset.pattern.permute.xlu1 %v2301_v46  ;;  %v3214_v47 = vmov 0.0   ;;  %v2303_v0 = vmov 1966171168   ;;  %v2304_v2 = vmov 1934713408   ;;  %v310_v11 = vcombine.high %v2420_v5, %v2420_v5  ;;  %s2307_s12 = smov [#allocation4]  }
   0xa   :  { %v71_v32 = vrot.slane %v63_v16, %v2401_v31  ;;  %v78_v33 = vrot.slane %v64_v20, %v2401_v31  ;;  %v88_v34 = vrot.slane %v80_v22, %v2401_v31  ;;  %v95_v35 = vrot.slane %v81_v23, %v2401_v31  ;;  %28 = vst.msk [vmem:[#allocation2] sm:$0x3] %vm27_vm2, %v3214_v47  ;;  %s2120_s13 = sshll.u32 %s2307_s12, 4  ;;  %s2121_s13 = int_to_ptr.vmem [resolvable:$true] %s2120_s13 }
   0xb   :  { %v105_v36 = vrot.slane %v97_v27, %v2401_v31  ;;  %v112_v37 = vrot.slane %v98_v28, %v2401_v31  ;;  %v122_v38 = vrot.slane %v114_v29, %v2401_v31  ;;  %v129_v39 = vrot.slane %v115_v30, %v2401_v31  ;;  %29 = vst.msk [vmem:[#allocation2 + $0x2] sm:$0x3] %vm27_vm2, %v3214_v47  ;;  %s2236_s14 = scalar_lea.vmem %s2121_s13, 512  ;;  %p2241_p1 = scmp.lt.s32.totalorder %s2121_s13, %s2121_s13 }
   0xc   :  { %v79_v40 = vcombine.low %v71_v32, %v78_v33  ;;  %v96_v41 = vcombine.low %v88_v34, %v95_v35  ;;  %30 = vst.msk [vmem:[#allocation3] sm:$0x3] %vm27_vm2, %v3214_v47  ;;  %v312_v1 = vunpack.c.l.s4 %v2303_v0  ;;  %v410_v3 = vunpack.c.l.s4 %v2304_v2  ;;  %p2237_p0 = scmp.ne.s32.totalorder %s2121_s13, %s2236_s14  ;;  %p2242_p2 = scmp.lt.s32.totalorder %s2236_s14, %s2236_s14 }
   0xd   :  { %v113_v42 = vcombine.low %v105_v36, %v112_v37  ;;  %v130_v43 = vcombine.low %v122_v38, %v129_v39  ;;  %vm572_vm3 = vcmask 130048   ;;  %vm989_vm4 = vcmask 1041409  }
   0xe   :  { %v135_v44 = vpack.c.bf16 %v96_v41, %v79_v40  ;;  %v313_v4 = vunpack.c.0.s8 %v312_v1  ;;  %v411_v9 = vunpack.c.0.s8 %v410_v3  ;;  %vm1343_vm5 = vcmask 1043459   ;;  %p2243_p3 = por %p2242_p2, %p2241_p1 }
   0xf   :  { %v136_v45 = vpack.c.bf16 %v130_v43, %v113_v42  ;;  %vm1345_vm6 = vcmask 1045509   ;;  %vm1347_vm7 = vcmask 1047559   ;;  %vm1078_vm8 = vcmask 122880  }
  0x10   :  { %2191 = vmatprep.mubr.msk.bf16.mxu0 %vm138_vm1, %v135_v44  ;;  %v2428_v12 = vsub.s32 %v313_v4, %v2374_v13  ;;  %v2448_v22 = vsub.s32 %v411_v9, %v2374_v13  ;;  %p2244_p4 = pnand %p2243_p3, %p2237_p0 }
  0x11   :  { %2192 = vmatmul.mubr.msk.bf16.vlgmr.msra.gmra.mxu0 %vm138_vm1, %v136_v45 }
  0x12   :  { %3218 = vst [vmem:[#allocation11_spill] sm:$0xff] %v2428_v12  ;;  %v2460_v27 = vrot.slane %v310_v11, %v2428_v12 }
  0x14   :  { %v326_v43 = vcombine.high %v2460_v27, %v2460_v27 }
  0xd1   :  { %v2193_v48 = vpop.f32.mrf.mxu0 }
  0xd2   :  { %v2164_v49 = vadd.f32 -1.0, %v2193_v48 }
  0xd3   :  { %v183_v50 = vpop.f32.mrf.mxu0 }
  0xd4   :  { %v204_v51 = vmul.f32 4.0, %v2164_v49  ;;  %v2162_v52 = vadd.f32 -1.0, %v183_v50 }
  0xd5   :  { %v2194_v53 = vpop.f32.mrf.mxu0 }
  0xd6   :  { %v210_v54 = vmul.f32 1.442695, %v204_v51  ;;  %v202_v55 = vmul.f32 4.0, %v2162_v52  ;;  %v2165_v56 = vadd.f32 -1.0, %v2194_v53 }
  0xd7   :  { %v186_v57 = vpop.f32.mrf.mxu0 }
  0xd8   :  { %2226 = vpow2.f32 %v210_v54  ;;  %v206_v58 = vmul.f32 1.442695, %v202_v55  ;;  %v205_v59 = vmul.f32 4.0, %v2165_v56  ;;  %v2163_v60 = vadd.f32 -1.0, %v186_v57  ;;  %v307_v55 = vld [vmem:[%s3210_s3 + $0x8] sm:$0xff]  ;;  %s2305_s3 = smov 16  }
  0xd9   :  { %v2517_v56 = vrot.slane %v326_v43, %v2428_v12  ;;  %v366_v1 = vrot.slane %v307_v55, %v2428_v12 }
  0xda   :  { %2228 = vpow2.f32 %v206_v58  ;;  %v212_v61 = vmul.f32 1.442695, %v205_v59  ;;  %v203_v62 = vmul.f32 4.0, %v2163_v60  ;;  %v2522_v58 = vld [vmem:[%s3209_s2] sm:$0xff] }
  0xdb   :  { %2199 = vmatprep.mubr.msk.f32.mxu1 %vm572_vm3, %v2522_v58 }
  0xdc   :  { %2230 = vpow2.f32 %v212_v61  ;;  %v208_v63 = vmul.f32 1.442695, %v203_v62 }
  0xde   :  { %2232 = vpow2.f32 %v208_v63 }
  0xe5   :  { %v2227_v6 = vpop.eup %2226 }
  0xe6   :  { %v252_v7 = vcombine.high %v2227_v6, %v2227_v6  ;;  %v2423_v8 = vrot.slane %v2227_v6, %v2401_v31 }
  0xe7   :  { %v2229_v10 = vpop.eup %2228 }
  0xe8   :  { %v218_v14 = vcombine.high %v2229_v10, %v2229_v10  ;;  %v2431_v15 = vrot.slane %v2229_v10, %v2401_v31  ;;  %v2434_v16 = vrot.slane %v252_v7, %v2401_v31  ;;  %v2438_v17 = vcombine.high %v2423_v8, %v2423_v8 }
  0xe9   :  { %v2231_v18 = vpop.eup %2230 }
  0xea   :  { %v2442_v19 = vcombine.high %v2434_v16, %v2434_v16  ;;  %v269_v20 = vcombine.high %v2231_v18, %v2231_v18  ;;  %v2445_v21 = vrot.slane %v2231_v18, %v2401_v31  ;;  %v444_v24 = vcombine.low %v2423_v8, %v2438_v17 }
  0xeb   :  { %v2233_v23 = vpop.eup %2232  ;;  %v2453_v25 = vrot.slane %v218_v14, %v2401_v31  ;;  %v2457_v26 = vcombine.high %v2431_v15, %v2431_v15 }
  0xec   :  { %v235_v28 = vcombine.high %v2233_v23, %v2233_v23  ;;  %v2463_v29 = vrot.slane %v2233_v23, %v2401_v31  ;;  %v2466_v30 = vrot.slane %v269_v20, %v2401_v31  ;;  %v2470_v32 = vcombine.high %v2445_v21, %v2445_v21 }
  0xed   :  { %v453_v33 = vcombine.low %v2434_v16, %v2442_v19  ;;  %v2476_v34 = vcombine.high %v2453_v25, %v2453_v25  ;;  %v408_v35 = vcombine.low %v2431_v15, %v2457_v26  ;;  %v451_v40 = vrot.slane %v444_v24, %v2448_v22 }
  0xee   :  { %v2482_v36 = vcombine.high %v2466_v30, %v2466_v30  ;;  %v462_v37 = vcombine.low %v2445_v21, %v2470_v32  ;;  %v2487_v38 = vrot.slane %v235_v28, %v2401_v31  ;;  %v2491_v39 = vcombine.high %v2463_v29, %v2463_v29 }
  0xef   :  { %v460_v41 = vrot.slane %v453_v33, %v2448_v22  ;;  %v417_v42 = vcombine.low %v2453_v25, %v2476_v34  ;;  %v415_v49 = vrot.slane %v408_v35, %v2448_v22  ;;  %v358_v20 = vcombine.high %v2517_v56, %v2517_v56 }
  0xf0   :  { %v471_v44 = vcombine.low %v2466_v30, %v2482_v36  ;;  %v2503_v45 = vcombine.high %v2487_v38, %v2487_v38  ;;  %v426_v46 = vcombine.low %v2463_v29, %v2491_v39  ;;  %v469_v52 = vrot.slane %v462_v37, %v2448_v22 }
  0xf1   :  { %v2168_v48 = vcombine.high %v451_v40, %v460_v41  ;;  %v424_v50 = vrot.slane %v417_v42, %v2448_v22  ;;  %v505_v51 = vcombine.low %v451_v40, %v460_v41  ;;  %v2549_v23 = vsub.s32 0, %v2374_v13 }
  0xf2   :  { %v478_v53 = vrot.slane %v471_v44, %v2448_v22  ;;  %v435_v54 = vcombine.low %v2487_v38, %v2503_v45  ;;  %v433_v60 = vrot.slane %v426_v46, %v2448_v22  ;;  %v382_v28 = vrot.slane %v366_v1, %v2428_v12 }
  0xf3   :  { %v488_v57 = vcombine.low %v415_v49, %v424_v50  ;;  %v557_v63 = vrot.slane %v2168_v48, %v2401_v31  ;;  %v2166_v0 = vcombine.high %v415_v49, %v424_v50  ;;  %v2531_v2 = vrot.slane %v505_v51, %v2401_v31  ;;  %v2564_v50 = vld [vmem:[#allocation2 + $0x2] sm:$0x3] }
  0xf4   :  { %v2169_v59 = vcombine.high %v469_v52, %v478_v53  ;;  %v442_v61 = vrot.slane %v435_v54, %v2448_v22  ;;  %v506_v62 = vcombine.low %v469_v52, %v478_v53  ;;  %v359_v33 = vcombine.high %v307_v55, %v307_v55  ;;  %v2570_v54 = vld [vmem:[#allocation2] sm:$0x3] }
  0xf5   :  { %v2538_v9 = vrot.slane %v488_v57, %v2401_v31  ;;  %v540_v24 = vrot.slane %v2166_v0, %v2401_v31  ;;  %v827_v40 = vrot.slane %v358_v20, %v2549_v23  ;;  %v404_v41 = vcombine.high %v382_v28, %v382_v28 }
  0xf6   :  { %v564_v3 = vrot.slane %v2169_v59, %v2401_v31  ;;  %v2167_v4 = vcombine.high %v433_v60, %v442_v61  ;;  %v2535_v6 = vrot.slane %v506_v62, %v2401_v31  ;;  %v489_v7 = vcombine.low %v433_v60, %v442_v61 }
  0xf7   :  { %v373_v13 = vrot.slane %v359_v33, %v2428_v12  ;;  %v839_v42 = vrot.slane %v404_v41, %v2549_v23  ;;  %v317_v44 = vrot.slane %v2420_v5, %v2428_v12  ;;  %v1126_v53 = vrot.slane %v2564_v50, %v2401_v31 }
  0xf8   :  { %v565_v10 = vcombine.low %v557_v63, %v564_v3  ;;  %v547_v11 = vrot.slane %v2167_v4, %v2401_v31  ;;  %v521_v14 = vcombine.low %v2531_v2, %v2535_v6  ;;  %v2544_v18 = vrot.slane %v489_v7, %v2401_v31 }
  0xf9   :  { %v389_v43 = vrot.slane %v373_v13, %v2428_v12  ;;  %v325_v49 = vcombine.high %v317_v44, %v317_v44  ;;  %v1119_v57 = vrot.slane %v2570_v54, %v2401_v31  ;;  %v1341_v59 = vrot.slane %v1126_v53, 7 }
  0xfa   :  { %568 = vrot.lane.b32.xlu0 %v565_v10, %s2305_s3  ;;  %v504_v35 = vcombine.low %v2538_v9, %v2544_v18  ;;  %v548_v37 = vcombine.low %v540_v24, %v547_v11  ;;  %v819_v63 = vrot.slane %v2517_v56, %v2549_v23  ;;  %v831_v3 = vrot.slane %v382_v28, %v2549_v23 }
  0xfb   :  { %v847_v46 = vrot.slane %v389_v43, %v2549_v23  ;;  %v405_v48 = vcombine.high %v389_v43, %v389_v43  ;;  %v347_v52 = vrot.slane %v325_v49, %v2428_v12  ;;  %v1342_v61 = vsel %vm989_vm4, %v1341_v59, %v1119_v57 }
  0xfc   :  { %v1344_v62 = vsel %vm1343_vm5, %v1341_v59, %v1342_v61  ;;  %v374_v4 = vcombine.high %v366_v1, %v366_v1  ;;  %893 = vperm.xlu1 %2223, %v831_v3   ;;  %v375_v11 = vcombine.high %v373_v13, %v373_v13  ;;  %v333_v28 = vrot.slane %v317_v44, %v2428_v12 }
  0xfd   :  { %v855_v51 = vrot.slane %v405_v48, %v2549_v23  ;;  %v803_v5 = vrot.slane %v347_v52, %v2549_v23  ;;  %v357_v55 = vcombine.high %v347_v52, %v347_v52  ;;  %v1346_v0 = vsel %vm1345_vm6, %v1341_v59, %v1344_v62  ;;  %v2612_v48 = vld [vmem:[%s3209_s2 + $0x8] sm:$0xff]  ;;  %s2306_s2 = smov 112  }
  0xfe   :  { %566 = vrot.lane.b32.xlu0 %v548_v37, %s2305_s3  ;;  %v1348_v7 = vsel %vm1347_vm7, %v1341_v59, %v1346_v0  ;;  %v396_v10 = vrot.slane %v374_v4, %v2428_v12  ;;  %v2588_v33 = vrot.slane %v375_v11, %v2428_v12  ;;  %v799_v37 = vrot.slane %v333_v28, %v2549_v23 }
  0xff   :  { %v811_v60 = vrot.slane %v357_v55, %v2549_v23  ;;  %v2597_v13 = vrot.slane %v2460_v27, %v2428_v12 }
 0x100   :  { %v835_v20 = vrot.slane %v396_v10, %v2549_v23  ;;  %v406_v24 = vcombine.high %v396_v10, %v396_v10  ;;  %v851_v1 = vrot.slane %v2588_v33, %v2549_v23 }
 0x102   :  { %889 = vperm.xlu0 %2222, %v827_v40   ;;  %897 = vperm.xlu1 %2223, %v835_v20   ;;  %v843_v56 = vrot.slane %v406_v24, %v2549_v23  ;;  %v355_v40 = vcombine.high %v333_v28, %v333_v28 }
 0x104   :  { %v807_v41 = vrot.slane %v355_v40, %v2549_v23 }
 0x106   :  { %901 = vperm.xlu0 %2222, %v839_v42   ;;  %905 = vperm.xlu1 %2223, %v843_v56   ;;  %v815_v42 = vrot.slane %v2597_v13, %v2549_v23 }
 0x10a   :  { %909 = vperm.xlu0 %2222, %v847_v46   ;;  %913 = vperm.xlu1 %2223, %v851_v1  }
 0x10e   :  { %917 = vperm.xlu0 %2222, %v855_v51   ;;  %861 = vperm.xlu1 %2223, %v799_v37  }
 0x112   :  { %865 = vperm.xlu0 %2222, %v803_v5   ;;  %869 = vperm.xlu1 %2223, %v807_v41  }
 0x116   :  { %873 = vperm.xlu0 %2222, %v811_v60   ;;  %877 = vperm.xlu1 %2223, %v815_v42  }
 0x11a   :  { %881 = vperm.xlu0 %2222, %v819_v63  }
 0x11e   :  { %1454 = vrot.lane.b32.xlu0 %v1348_v7, %s2305_s3 }
 0x16c   :  { %v569_v43 = vpop.permute.xlu0 %568 }
 0x16d   :  { %v574_v44 = vsel %vm572_vm3, %v521_v14, %v569_v43 }
 0x16e   :  { %2195 = vmatprep.subr.mxu1 %v574_v44 }
 0x16f   :  { %2196 = vmatpush3.msra.mxu1 %v574_v44 }
 0x170   :  { %v567_v46 = vpop.permute.xlu0 %566 }
 0x171   :  { %v573_v27 = vsel %vm572_vm3, %v504_v35, %v567_v46 }
 0x172   :  { %2197 = vmatprep.subr.mxu1 %v573_v27 }
 0x173   :  { %2198 = vmatpush3.msra.mxu1 %v573_v27 }
 0x174   :  { %2200 = vmatmul.mubr.msk.f32.vlgmr.msra.gmra.mxu1 %vm572_vm3, %v2612_v48 }
 0x175   :  { %2206 = vmatprep.mubr.msk.f32.mxu1 %vm572_vm3, %v2522_v58 }
 0x177   :  { %v894_v44 = vpop.permute.xlu1 %893 }
 0x178   :  { %v2696_v46 = vmul.f32 %v894_v44, %v2570_v54  ;;  %v2699_v27 = vmul.f32 %v894_v44, %v2564_v50 }
 0x17d   :  { %v890_v2 = vpop.permute.xlu0 %889 }
 0x17e   :  { %v2619_v6 = vmul.f32 %v890_v2, %v2570_v54  ;;  %v2622_v9 = vmul.f32 %v890_v2, %v2564_v50  ;;  %v1979_v2 = vrot.slane %v2696_v46, 1 }
 0x180   :  { %v1977_v14 = vrot.slane %v2619_v6, 1 }
 0x181   :  { %v902_v18 = vpop.permute.xlu0 %901 }
 0x182   :  { %v2627_v35 = vsel %vm989_vm4, %v2622_v9, %v1977_v14  ;;  %v2630_v49 = vmul.f32 %v902_v18, %v2570_v54  ;;  %v2633_v51 = vmul.f32 %v902_v18, %v2564_v50  ;;  %v898_v14 = vpop.permute.xlu1 %897  ;;  %v2704_v18 = vsel %vm989_vm4, %v2699_v27, %v1979_v2 }
 0x183   :  { %3219 = vst [vmem:[#allocation12_spill] sm:$0xff] %v2627_v35  ;;  %3226 = vst [vmem:[#allocation19_spill] sm:$0xff] %v2704_v18 }
 0x184   :  { %v1983_v58 = vrot.slane %v2630_v49, 1 }
 0x185   :  { %v910_v52 = vpop.permute.xlu0 %909 }
 0x186   :  { %v2638_v53 = vsel %vm989_vm4, %v2633_v51, %v1983_v58  ;;  %v2641_v5 = vmul.f32 %v910_v52, %v2570_v54  ;;  %v2644_v55 = vmul.f32 %v910_v52, %v2564_v50  ;;  %v2707_v58 = vmul.f32 %v898_v14, %v2570_v54 }
 0x187   :  { %3220 = vst [vmem:[#allocation13_spill] sm:$0xff] %v2638_v53  ;;  %v2710_v52 = vmul.f32 %v898_v14, %v2564_v50  ;;  %v1005_v53 = vrot.slane %v2699_v27, 7 }
 0x188   :  { %v1987_v57 = vrot.slane %v2641_v5, 1 }
 0x189   :  { %v918_v59 = vpop.permute.xlu0 %917  ;;  %v1007_v18 = vrot.slane %v2710_v52, 7 }
 0x18a   :  { %v2649_v60 = vsel %vm989_vm4, %v2644_v55, %v1987_v57  ;;  %v2652_v61 = vmul.f32 %v918_v59, %v2570_v54  ;;  %v2655_v62 = vmul.f32 %v918_v59, %v2564_v50  ;;  %v1981_v57 = vrot.slane %v2707_v58, 1  ;;  %v906_v59 = vpop.permute.xlu1 %905 }
 0x18b   :  { %3221 = vst [vmem:[#allocation14_spill] sm:$0xff] %v2649_v60  ;;  %v1009_v60 = vrot.slane %v2633_v51, 7 }
 0x18c   :  { %v1991_v63 = vrot.slane %v2652_v61, 1 }
 0x18d   :  { %v866_v0 = vpop.permute.xlu0 %865  ;;  %v1010_v51 = vsel %vm989_vm4, %v1009_v60, %v2630_v49 }
 0x18e   :  { %v2660_v3 = vsel %vm989_vm4, %v2655_v62, %v1991_v63  ;;  %v2663_v4 = vmul.f32 %v866_v0, %v2570_v54  ;;  %v2666_v7 = vmul.f32 %v866_v0, %v2564_v50  ;;  %v2715_v63 = vsel %vm989_vm4, %v2710_v52, %v1981_v57 }
 0x18f   :  { %3222 = vst [vmem:[#allocation15_spill] sm:$0xff] %v2660_v3  ;;  %3227 = vst [vmem:[#allocation20_spill] sm:$0xff] %v2715_v63  ;;  %v946_v0 = vmul.f32 %v906_v59, %v2570_v54 }
 0x190   :  { %v1965_v10 = vrot.slane %v2663_v4, 1 }
 0x191   :  { %v874_v11 = vpop.permute.xlu0 %873 }
 0x192   :  { %v2671_v20 = vsel %vm989_vm4, %v2666_v7, %v1965_v10  ;;  %v2674_v24 = vmul.f32 %v874_v11, %v2570_v54  ;;  %v2677_v56 = vmul.f32 %v874_v11, %v2564_v50  ;;  %v947_v10 = vmul.f32 %v906_v59, %v2564_v50 }
 0x193   :  { %3223 = vst [vmem:[#allocation16_spill] sm:$0xff] %v2671_v20  ;;  %v1985_v11 = vrot.slane %v946_v0, 1 }
 0x194   :  { %v1969_v1 = vrot.slane %v2674_v24, 1  ;;  %v995_v63 = vrot.slane %v2677_v56, 7 }
 0x195   :  { %v882_v28 = vpop.permute.xlu0 %881 }
 0x196   :  { %v2682_v37 = vsel %vm989_vm4, %v2677_v56, %v1969_v1  ;;  %v2685_v40 = vmul.f32 %v882_v28, %v2570_v54  ;;  %v2688_v41 = vmul.f32 %v882_v28, %v2564_v50  ;;  %v914_v1 = vpop.permute.xlu1 %913  ;;  %v2720_v28 = vsel %vm989_vm4, %v947_v10, %v1985_v11 }
 0x197   :  { %3224 = vst [vmem:[#allocation17_spill] sm:$0xff] %v2682_v37  ;;  %3228 = vst [vmem:[#allocation21_spill] sm:$0xff] %v2720_v28  ;;  %v951_v44 = vmul.f32 %v914_v1, %v2564_v50  ;;  %v991_v28 = vrot.slane %v2666_v7, 7 }
 0x198   :  { %v1973_v42 = vrot.slane %v2685_v40, 1 }
 0x199   :  { %v2781_v56 = vsel %vm989_vm4, %v991_v28, %v2663_v4  ;;  %v1006_v4 = vsel %vm989_vm4, %v1005_v53, %v2696_v46 }
 0x19a   :  { %v2693_v43 = vsel %vm989_vm4, %v2688_v41, %v1973_v42  ;;  %v950_v42 = vmul.f32 %v914_v1, %v2570_v54  ;;  %v862_v14 = vpop.permute.xlu1 %861 }
 0x19b   :  { %3225 = vst [vmem:[#allocation18_spill] sm:$0xff] %v2693_v43  ;;  %v924_v57 = vmul.f32 %v862_v14, %v2570_v54  ;;  %v925_v12 = vmul.f32 %v862_v14, %v2564_v50 }
 0x19c   :  { %v1989_v2 = vrot.slane %v950_v42, 1 }
 0x19d   :  { %v1963_v35 = vrot.slane %v924_v57, 1  ;;  %v988_v27 = vrot.slane %v925_v12, 7 }
 0x19e   :  { %v2725_v47 = vsel %vm989_vm4, %v951_v44, %v1989_v2  ;;  %v870_v59 = vpop.permute.xlu1 %869 }
 0x19f   :  { %3229 = vst [vmem:[#allocation22_spill] sm:$0xff] %v2725_v47  ;;  %v2730_v43 = vsel %vm989_vm4, %v925_v12, %v1963_v35  ;;  %v2733_v11 = vmul.f32 %v870_v59, %v2570_v54  ;;  %v2736_v37 = vmul.f32 %v870_v59, %v2564_v50  ;;  %v1008_v12 = vsel %vm989_vm4, %v1007_v18, %v2707_v58 }
 0x1a0   :  { %3230 = vst [vmem:[#allocation23_spill] sm:$0xff] %v2730_v43 }
 0x1a1   :  { %v1967_v1 = vrot.slane %v2733_v11, 1 }
 0x1a2   :  { %v878_v20 = vpop.permute.xlu1 %877 }
 0x1a3   :  { %v2741_v2 = vsel %vm989_vm4, %v2736_v37, %v1967_v1  ;;  %v2744_v14 = vmul.f32 %v878_v20, %v2570_v54  ;;  %v2747_v47 = vmul.f32 %v878_v20, %v2564_v50  ;;  %v356_v1 = vcombine.high %v2597_v13, %v2597_v13 }
 0x1a4   :  { %3231 = vst [vmem:[#allocation24_spill] sm:$0xff] %v2741_v2  ;;  %v1003_v20 = vrot.slane %v2622_v9, 7  ;;  %v999_v13 = vrot.slane %v2688_v41, 7  ;;  %v1015_v41 = vrot.slane %v951_v44, 7 }
 0x1a5   :  { %v1971_v35 = vrot.slane %v2744_v14, 1  ;;  %v823_v3 = vrot.slane %v356_v1, %v2549_v23  ;;  %v1011_v1 = vrot.slane %v947_v10, 7 }
 0x1a6   :  { %v2770_v9 = vsel %vm989_vm4, %v1003_v20, %v2619_v6  ;;  %v2785_v6 = vsel %vm989_vm4, %v995_v63, %v2674_v24  ;;  %v1016_v44 = vsel %vm989_vm4, %v1015_v41, %v950_v42  ;;  %v997_v20 = vrot.slane %v2747_v47, 7 }
 0x1a7   :  { %v2752_v43 = vsel %vm989_vm4, %v2747_v47, %v1971_v35  ;;  %v1013_v35 = vrot.slane %v2644_v55, 7 }
 0x1a8   :  { %3232 = vst [vmem:[#allocation25_spill] sm:$0xff] %v2752_v43  ;;  %v1017_v43 = vrot.slane %v2655_v62, 7  ;;  %v3233_v62 = vmov 0.0  }
 0x1a9   :  { %v1014_v55 = vsel %vm989_vm4, %v1013_v35, %v2641_v5 }
 0x1aa   :  { %v1018_v7 = vsel %vm989_vm4, %v1017_v43, %v2652_v61  ;;  %v2792_v61 = vsel %vm989_vm4, %v999_v13, %v2685_v40  ;;  %v1012_v43 = vsel %vm989_vm4, %v1011_v1, %v946_v0  ;;  %v993_v40 = vrot.slane %v2736_v37, 7 }
 0x1ac   :  { %v994_v41 = vsel %vm989_vm4, %v993_v40, %v2733_v11 }
 0x234   :  { %v2201_v59 = vpop.f32.mrf.mxu1 }
 0x235   :  { %660 = vrot.lane.b32.xlu1 %v2201_v59, %s2306_s2  ;;  %v737_v49 = vrot.slane %v2201_v59, %v2401_v31 }
 0x236   :  { %v647_v2 = vpop.f32.mrf.mxu1 }
 0x237   :  { %v664_v35 = vcombine.high %v647_v2, %v3233_v62  ;;  %v671_v13 = vrot.slane %v647_v2, %v2401_v31 }
 0x239   :  { %658 = vrot.lane.b32.xlu1 %v647_v2, %s2306_s2 }
 0x23d   :  { %885 = vperm.xlu1 %2223, %v823_v3   ;;  %v730_v3 = vcombine.high %v2201_v59, %v3233_v62  ;;  %v990_v59 = vsel %vm989_vm4, %v988_v27, %v924_v57 }
 0x23f   :  { %v744_v24 = vrot.slane %v730_v3, %v2401_v31 }
 0x2a7   :  { %v661_v52 = vpop.permute.xlu1 %660 }
 0x2a8   :  { %v745_v5 = vcombine.high %v661_v52, %v3233_v62  ;;  %v752_v60 = vrot.slane %v661_v52, %v2401_v31 }
 0x2aa   :  { %v759_v63 = vrot.slane %v745_v5, %v2401_v31  ;;  %v760_v10 = vcombine.low %v737_v49, %v752_v60  ;;  %v761_v28 = vcombine.high %v737_v49, %v752_v60 }
 0x2ab   :  { %v659_v53 = vpop.permute.xlu1 %658 }
 0x2ac   :  { %v768_v46 = vrot.slane %v760_v10, %v2448_v22  ;;  %v775_v18 = vrot.slane %v761_v28, %v2448_v22  ;;  %v776_v58 = vcombine.low %v744_v24, %v759_v63  ;;  %v777_v0 = vcombine.high %v744_v24, %v759_v63 }
 0x2ad   :  { %v679_v1 = vcombine.high %v659_v53, %v3233_v62  ;;  %v686_v42 = vrot.slane %v659_v53, %v2401_v31  ;;  %v998_v63 = vsel %vm989_vm4, %v997_v20, %v2744_v14 }
 0x2ae   :  { %v784_v57 = vrot.slane %v776_v58, %v2448_v22  ;;  %v2813_v37 = vrot.slane %v777_v0, %v2448_v22  ;;  %v792_v47 = vcombine.high %v768_v46, %v3233_v62  ;;  %v793_v3 = vcombine.high %v775_v18, %v3233_v62 }
 0x2af   :  { %v1045_v27 = vadd.f32 %v1006_v4, %v768_v46  ;;  %v2819_v52 = vadd.f32 %v1010_v51, %v775_v18  ;;  %v694_v2 = vcombine.low %v671_v13, %v686_v42  ;;  %v693_v11 = vrot.slane %v679_v1, %v2401_v31 }
 0x2b0   :  { %v794_v49 = vcombine.high %v784_v57, %v3233_v62  ;;  %v1046_v5 = vadd.f32 %v1008_v12, %v792_v47  ;;  %v2822_v60 = vadd.f32 %v1012_v43, %v793_v3  ;;  %v2824_v24 = vadd.f32 %v1014_v55, %v784_v57 }
 0x2b1   :  { %v2829_v10 = vadd.f32 %v1018_v7, %v2813_v37  ;;  %v1104_v28 = vrot.slane %v1045_v27, 1  ;;  %v678_v51 = vrot.slane %v664_v35, %v2401_v31  ;;  %v1106_v40 = vrot.slane %v2819_v52, 1 }
 0x2b2   :  { %v1105_v4 = vrot.slane %v1046_v5, 1  ;;  %v1245_v12 = vrot.slane %v1045_v27, %v2401_v31  ;;  %v2835_v43 = vadd.f32 %v1016_v44, %v794_v49  ;;  %v1107_v55 = vrot.slane %v2822_v60, 1 }
 0x2b3   :  { %v1108_v53 = vrot.slane %v2824_v24, 1  ;;  %v1110_v14 = vrot.slane %v2829_v10, 1  ;;  %v1259_v7 = vrot.slane %v1046_v5, %v2401_v31  ;;  %v1273_v20 = vrot.slane %v2819_v52, %v2401_v31 }
 0x2b4   :  { %v695_v46 = vcombine.high %v671_v13, %v686_v42  ;;  %v702_v18 = vrot.slane %v694_v2, %v2448_v22  ;;  %v710_v58 = vcombine.low %v678_v51, %v693_v11  ;;  %v711_v0 = vcombine.high %v678_v51, %v693_v11 }
 0x2b5   :  { %v1252_v35 = vrot.slane %v1104_v28, %v2401_v31  ;;  %v1266_v44 = vrot.slane %v1105_v4, %v2401_v31  ;;  %v1287_v1 = vrot.slane %v2822_v60, %v2401_v31  ;;  %v1301_v13 = vrot.slane %v2824_v24, %v2401_v31 }
 0x2b6   :  { %v709_v57 = vrot.slane %v695_v46, %v2448_v22  ;;  %v726_v47 = vcombine.high %v702_v18, %v3233_v62  ;;  %v2850_v3 = vadd.f32 %v990_v59, %v702_v18  ;;  %v718_v42 = vrot.slane %v710_v58, %v2448_v22 }
 0x2b7   :  { %v725_v27 = vrot.slane %v711_v0, %v2448_v22  ;;  %v1280_v52 = vrot.slane %v1106_v40, %v2401_v31  ;;  %v1407_v60 = vrot.slane %v1252_v35, 7  ;;  %v1414_v51 = vrot.slane %v1266_v44, 7 }
 0x2b8   :  { %v727_v2 = vcombine.high %v709_v57, %v3233_v62  ;;  %v2859_v49 = vadd.f32 %v2781_v56, %v726_v47  ;;  %v2861_v5 = vadd.f32 %v994_v41, %v709_v57  ;;  %v728_v59 = vcombine.high %v718_v42, %v3233_v62  ;;  %v886_v24 = vpop.permute.xlu1 %885 }
 0x2b9   :  { %v729_v28 = vcombine.high %v725_v27, %v3233_v62  ;;  %v2865_v11 = vadd.f32 %v998_v63, %v718_v42  ;;  %v1329_v4 = vrot.slane %v2829_v10, %v2401_v31  ;;  %v1096_v56 = vrot.slane %v2850_v3, 1 }
 0x2ba   :  { %v2870_v40 = vadd.f32 %v2785_v6, %v727_v2  ;;  %v1133_v41 = vrot.slane %v2850_v3, %v2401_v31  ;;  %v2876_v46 = vadd.f32 %v2792_v61, %v728_v59  ;;  %v1097_v18 = vrot.slane %v2859_v49, 1 }
 0x2bb   :  { %v1098_v63 = vrot.slane %v2861_v5, 1  ;;  %v1147_v58 = vrot.slane %v2859_v49, %v2401_v31  ;;  %v2883_v0 = vadd.f32 %v2770_v9, %v729_v28  ;;  %v936_v44 = vmul.f32 %v886_v24, %v2570_v54 }
 0x2bc   :  { %v937_v61 = vmul.f32 %v886_v24, %v2564_v50  ;;  %v1408_v57 = vsel %vm989_vm4, %v1407_v60, %v1245_v12  ;;  %v1415_v47 = vsel %vm989_vm4, %v1414_v51, %v1259_v7  ;;  %v1421_v42 = vrot.slane %v1280_v52, 7 }
 0x2bd   :  { %v1975_v2 = vrot.slane %v936_v44, 1  ;;  %v1409_v49 = vsel %vm1343_vm5, %v1407_v60, %v1408_v57  ;;  %v1416_v9 = vsel %vm1343_vm5, %v1414_v51, %v1415_v47  ;;  %v1294_v59 = vrot.slane %v1107_v55, %v2401_v31 }
 0x2be   :  { %v1001_v28 = vrot.slane %v937_v61, 7  ;;  %v1410_v6 = vsel %vm1345_vm6, %v1407_v60, %v1409_v49  ;;  %v1417_v35 = vsel %vm1345_vm6, %v1414_v51, %v1416_v9  ;;  %v1422_v54 = vsel %vm989_vm4, %v1421_v42, %v1273_v20 }
 0x2bf   :  { %v2899_v50 = vsel %vm989_vm4, %v937_v61, %v1975_v2  ;;  %v1411_v12 = vsel %vm1347_vm7, %v1407_v60, %v1410_v6  ;;  %v1418_v7 = vsel %vm1347_vm7, %v1414_v51, %v1417_v35  ;;  %v1423_v52 = vsel %vm1343_vm5, %v1421_v42, %v1422_v54 }
 0x2c0   :  { %v1002_v24 = vsel %vm989_vm4, %v1001_v28, %v936_v44  ;;  %1472 = vrot.lane.b32.xlu1 %v1411_v12, %s2305_s3  ;;  %1474 = vrot.lane.b32.xlu0 %v1418_v7, %s2305_s3  ;;  %v1424_v55 = vsel %vm1345_vm6, %v1421_v42, %v1423_v52  ;;  %v1428_v57 = vrot.slane %v1294_v59, 7  ;;  %v1308_v20 = vrot.slane %v1108_v53, %v2401_v31 }
 0x2c1   :  { %v1099_v61 = vrot.slane %v2870_v40, 1  ;;  %v1175_v60 = vrot.slane %v2870_v40, %v2401_v31  ;;  %v2912_v6 = vadd.f32 %v1002_v24, %v725_v27  ;;  %v1109_v51 = vrot.slane %v2835_v43, 1 }
 0x2c2   :  { %v1429_v35 = vsel %vm989_vm4, %v1428_v57, %v1287_v1  ;;  %v1435_v44 = vrot.slane %v1308_v20, 7  ;;  %v1336_v47 = vrot.slane %v1110_v14, %v2401_v31  ;;  %v1154_v2 = vrot.slane %v1097_v18, %v2401_v31 }
 0x2c3   :  { %v1425_v53 = vsel %vm1347_vm7, %v1421_v42, %v1424_v55  ;;  %v1430_v49 = vsel %vm1343_vm5, %v1428_v57, %v1429_v35  ;;  %v1315_v40 = vrot.slane %v2835_v43, %v2401_v31  ;;  %v1322_v27 = vrot.slane %v1109_v51, %v2401_v31 }
 0x2c4   :  { %1476 = vrot.lane.b32.xlu1 %v1425_v53, %s2305_s3  ;;  %v1431_v1 = vsel %vm1345_vm6, %v1428_v57, %v1430_v49  ;;  %v1436_v9 = vsel %vm989_vm4, %v1435_v44, %v1301_v13  ;;  %v1449_v59 = vrot.slane %v1336_v47, 7  ;;  %v1358_v10 = vrot.slane %v1154_v2, 7 }
 0x2c5   :  { %v1432_v14 = vsel %vm1347_vm7, %v1428_v57, %v1431_v1  ;;  %v1437_v18 = vsel %vm1343_vm5, %v1435_v44, %v1436_v9  ;;  %v1442_v42 = vrot.slane %v1322_v27, 7  ;;  %v1140_v28 = vrot.slane %v1096_v56, %v2401_v31 }
 0x2c6   :  { %1478 = vrot.lane.b32.xlu0 %v1432_v14, %s2305_s3  ;;  %v1438_v43 = vsel %vm1345_vm6, %v1435_v44, %v1437_v18  ;;  %v1450_v54 = vsel %vm989_vm4, %v1449_v59, %v1329_v4  ;;  %v1359_v12 = vsel %vm989_vm4, %v1358_v10, %v1147_v58  ;;  %v1182_v7 = vrot.slane %v1099_v61, %v2401_v31 }
 0x2c7   :  { %v1439_v13 = vsel %vm1347_vm7, %v1435_v44, %v1438_v43  ;;  %v1443_v52 = vsel %vm989_vm4, %v1442_v42, %v1315_v40  ;;  %v1451_v24 = vsel %vm1343_vm5, %v1449_v59, %v1450_v54  ;;  %v1360_v55 = vsel %vm1343_vm5, %v1358_v10, %v1359_v12 }
 0x2c8   :  { %v1189_v56 = vrot.slane %v2865_v11, %v2401_v31  ;;  %1480 = vrot.lane.b32.xlu1 %v1439_v13, %s2305_s3  ;;  %v1444_v57 = vsel %vm1343_vm5, %v1442_v42, %v1443_v52  ;;  %v1452_v4 = vsel %vm1345_vm6, %v1449_v59, %v1451_v24  ;;  %v1351_v58 = vrot.slane %v1140_v28, 7 }
 0x2c9   :  { %v1102_v20 = vrot.slane %v2912_v6, 1  ;;  %v1445_v61 = vsel %vm1345_vm6, %v1442_v42, %v1444_v57  ;;  %v1361_v51 = vsel %vm1345_vm6, %v1358_v10, %v1360_v55  ;;  %v1372_v35 = vrot.slane %v1182_v7, 7 }
 0x2ca   :  { %v1446_v44 = vsel %vm1347_vm7, %v1442_v42, %v1445_v61  ;;  %v1352_v47 = vsel %vm989_vm4, %v1351_v58, %v1133_v41  ;;  %v1168_v2 = vrot.slane %v1098_v63, %v2401_v31  ;;  %v1103_v53 = vrot.slane %v2883_v0, 1 }
 0x2cb   :  { %1482 = vrot.lane.b32.xlu0 %v1446_v44, %s2305_s3  ;;  %v1453_v49 = vsel %vm1347_vm7, %v1449_v59, %v1452_v4  ;;  %v1353_v40 = vsel %vm1343_vm5, %v1351_v58, %v1352_v47  ;;  %v1373_v27 = vsel %vm989_vm4, %v1372_v35, %v1175_v60  ;;  %v3234_v1 = vrot.slane %v2865_v11, 1 }
 0x2cc   :  { %1484 = vrot.lane.b32.xlu1 %v1453_v49, %s2305_s3  ;;  %v1354_v41 = vsel %vm1345_vm6, %v1351_v58, %v1353_v40  ;;  %v1374_v63 = vsel %vm1343_vm5, %v1372_v35, %v1373_v27  ;;  %v1365_v9 = vrot.slane %v1168_v2, 7  ;;  %v1238_v14 = vrot.slane %v1103_v53, %v2401_v31  ;;  %v1455_v27 = vpop.permute.xlu0 %1454 }
 0x2cd   :  { %v1196_v3 = vrot.slane %v3234_v1, %v2401_v31  ;;  %v1362_v18 = vsel %vm1347_vm7, %v1358_v10, %v1361_v51  ;;  %v1231_v59 = vrot.slane %v2883_v0, %v2401_v31  ;;  %v1101_v60 = vrot.slane %v2876_v46, 1 }
 0x2ce   :  { %v1355_v11 = vsel %vm1347_vm7, %v1351_v58, %v1354_v41  ;;  %v1375_v28 = vsel %vm1345_vm6, %v1372_v35, %v1374_v63  ;;  %v3235_v43 = vrot.slane %v2861_v5, %v2401_v31  ;;  %v1400_v12 = vrot.slane %v1238_v14, 7 }
 0x2cf   :  { %v1379_v42 = vrot.slane %v1196_v3, 7  ;;  %1458 = vrot.lane.b32.xlu0 %v1362_v18, %s2305_s3  ;;  %v1210_v0 = vrot.slane %v1101_v60, %v2401_v31  ;;  %v1224_v13 = vrot.slane %v1102_v20, %v2401_v31  ;;  %v1203_v57 = vrot.slane %v2876_v46, %v2401_v31 }
 0x2d0   :  { %v1366_v54 = vsel %vm989_vm4, %v1365_v9, %v3235_v43  ;;  %1456 = vrot.lane.b32.xlu1 %v1355_v11, %s2305_s3  ;;  %v1401_v24 = vsel %vm989_vm4, %v1400_v12, %v1231_v59  ;;  %v1376_v58 = vsel %vm1347_vm7, %v1372_v35, %v1375_v28  ;;  %v1502_v41 = vmul.f32 %v1455_v27, %v2431_v15 }
 0x2d1   :  { %v1367_v10 = vsel %vm1343_vm5, %v1365_v9, %v1366_v54  ;;  %v1380_v7 = vsel %vm989_vm4, %v1379_v42, %v1189_v56  ;;  %v1402_v5 = vsel %vm1343_vm5, %v1400_v12, %v1401_v24  ;;  %v1386_v4 = vrot.slane %v1210_v0, 7 }
 0x2d2   :  { %v1368_v52 = vsel %vm1345_vm6, %v1365_v9, %v1367_v10  ;;  %v1381_v55 = vsel %vm1343_vm5, %v1379_v42, %v1380_v7  ;;  %v1217_v56 = vrot.slane %v2912_v6, %v2401_v31  ;;  %v1393_v20 = vrot.slane %v1224_v13, 7 }
 0x2d3   :  { %1462 = vrot.lane.b32.xlu0 %v1376_v58, %s2305_s3  ;;  %v1369_v61 = vsel %vm1347_vm7, %v1365_v9, %v1368_v52  ;;  %v1403_v51 = vsel %vm1345_vm6, %v1400_v12, %v1402_v5  ;;  %v1387_v44 = vsel %vm989_vm4, %v1386_v4, %v1203_v57  ;;  %v1382_v47 = vsel %vm1345_vm6, %v1379_v42, %v1381_v55 }
 0x2d4   :  { %1460 = vrot.lane.b32.xlu1 %v1369_v61, %s2305_s3  ;;  %v1388_v46 = vsel %vm1343_vm5, %v1386_v4, %v1387_v44  ;;  %v1394_v2 = vsel %vm989_vm4, %v1393_v20, %v1217_v56  ;;  %v1404_v35 = vsel %vm1347_vm7, %v1400_v12, %v1403_v51  ;;  %v1383_v53 = vsel %vm1347_vm7, %v1379_v42, %v1382_v47 }
 0x2d5   :  { %v1395_v6 = vsel %vm1343_vm5, %v1393_v20, %v1394_v2  ;;  %v1389_v49 = vsel %vm1345_vm6, %v1386_v4, %v1388_v46 }
 0x2d6   :  { %v1396_v40 = vsel %vm1345_vm6, %v1393_v20, %v1395_v6  ;;  %v1390_v1 = vsel %vm1347_vm7, %v1386_v4, %v1389_v49 }
 0x2d7   :  { %1470 = vrot.lane.b32.xlu0 %v1404_v35, %s2305_s3  ;;  %v1397_v3 = vsel %vm1347_vm7, %v1393_v20, %v1396_v40 }
 0x2d8   :  { %1464 = vrot.lane.b32.xlu1 %v1383_v53, %s2305_s3 }
 0x2db   :  { %1466 = vrot.lane.b32.xlu0 %v1390_v1, %s2305_s3 }
 0x2dc   :  { %1468 = vrot.lane.b32.xlu1 %v1397_v3, %s2305_s3 }
 0x2df   :  { %1534 = vrot.lane.b32.xlu0 %v1502_v41, %s2306_s2 }
 0x332   :  { %v1473_v63 = vpop.permute.xlu1 %1472  ;;  %v1475_v9 = vpop.permute.xlu0 %1474 }
 0x333   :  { %v1511_v14 = vmul.f32 %v1473_v63, %v2438_v17  ;;  %v1512_v18 = vmul.f32 %v1475_v9, %v2434_v16 }
 0x335   :  { %1552 = vrot.lane.b32.xlu1 %v1511_v14, %s2306_s2  ;;  %1554 = vrot.lane.b32.xlu0 %v1512_v18, %s2306_s2 }
 0x336   :  { %v1477_v59 = vpop.permute.xlu1 %1476 }
 0x337   :  { %v1513_v42 = vmul.f32 %v1477_v59, %v2442_v19 }
 0x338   :  { %v1479_v60 = vpop.permute.xlu0 %1478 }
 0x339   :  { %v1514_v11 = vmul.f32 %v1479_v60, %v2445_v21  ;;  %1556 = vrot.lane.b32.xlu1 %v1513_v42, %s2306_s2 }
 0x33a   :  { %v1481_v15 = vpop.permute.xlu1 %1480 }
 0x33b   :  { %v1515_v28 = vmul.f32 %v1481_v15, %v2470_v32  ;;  %1558 = vrot.lane.b32.xlu0 %v1514_v11, %s2306_s2 }
 0x33d   :  { %v1483_v17 = vpop.permute.xlu0 %1482  ;;  %1560 = vrot.lane.b32.xlu1 %v1515_v28, %s2306_s2 }
 0x33e   :  { %v1516_v16 = vmul.f32 %v1483_v17, %v2466_v30  ;;  %v1485_v43 = vpop.permute.xlu1 %1484 }
 0x33f   :  { %v1517_v54 = vmul.f32 %v1485_v43, %v2482_v36 }
 0x340   :  { %1562 = vrot.lane.b32.xlu0 %v1516_v16, %s2306_s2 }
 0x341   :  { %v1459_v19 = vpop.permute.xlu0 %1458  ;;  %1564 = vrot.lane.b32.xlu1 %v1517_v54, %s2306_s2 }
 0x342   :  { %v1504_v21 = vmul.f32 %v1459_v19, %v2453_v25  ;;  %v1457_v12 = vpop.permute.xlu1 %1456 }
 0x343   :  { %v1503_v32 = vmul.f32 %v1457_v12, %v2457_v26 }
 0x344   :  { %1538 = vrot.lane.b32.xlu0 %v1504_v21, %s2306_s2 }
 0x345   :  { %v1463_v10 = vpop.permute.xlu0 %1462  ;;  %1536 = vrot.lane.b32.xlu1 %v1503_v32, %s2306_s2 }
 0x346   :  { %v1506_v30 = vmul.f32 %v1463_v10, %v2463_v29  ;;  %v1461_v7 = vpop.permute.xlu1 %1460 }
 0x347   :  { %v1505_v36 = vmul.f32 %v1461_v7, %v2476_v34 }
 0x348   :  { %1542 = vrot.lane.b32.xlu0 %v1506_v30, %s2306_s2 }
 0x349   :  { %v1471_v0 = vpop.permute.xlu0 %1470  ;;  %1540 = vrot.lane.b32.xlu1 %v1505_v36, %s2306_s2 }
 0x34a   :  { %v1510_v25 = vmul.f32 %v1471_v0, %v2423_v8  ;;  %v1465_v13 = vpop.permute.xlu1 %1464 }
 0x34b   :  { %v1507_v26 = vmul.f32 %v1465_v13, %v2491_v39 }
 0x34c   :  { %1550 = vrot.lane.b32.xlu0 %v1510_v25, %s2306_s2 }
 0x34d   :  { %v1467_v52 = vpop.permute.xlu0 %1466  ;;  %1544 = vrot.lane.b32.xlu1 %v1507_v26, %s2306_s2 }
 0x34e   :  { %v1508_v29 = vmul.f32 %v1467_v52, %v2487_v38  ;;  %v1469_v24 = vpop.permute.xlu1 %1468 }
 0x34f   :  { %v1509_v34 = vmul.f32 %v1469_v24, %v2503_v45 }
 0x350   :  { %1546 = vrot.lane.b32.xlu0 %v1508_v29, %s2306_s2 }
 0x351   :  { %1548 = vrot.lane.b32.xlu1 %v1509_v34, %s2306_s2  ;;  %v1535_v5 = vpop.permute.xlu0 %1534 }
 0x3a7   :  { %v1553_v55 = vpop.permute.xlu1 %1552  ;;  %v1555_v8 = vpop.permute.xlu0 %1554 }
 0x3ab   :  { %v1557_v57 = vpop.permute.xlu1 %1556 }
 0x3ac   :  { %v1627_v53 = vcombine.low %v1555_v8, %v1557_v57 }
 0x3ad   :  { %v1559_v4 = vpop.permute.xlu0 %1558 }
 0x3ae   :  { %v1634_v63 = vrot.slane %v1627_v53, %v2448_v22 }
 0x3af   :  { %v1561_v39 = vpop.permute.xlu1 %1560 }
 0x3b0   :  { %v1636_v56 = vcombine.low %v1559_v4, %v1561_v39 }
 0x3b2   :  { %v1563_v58 = vpop.permute.xlu0 %1562  ;;  %v1643_v51 = vrot.slane %v1636_v56, %v2448_v22 }
 0x3b3   :  { %v1565_v20 = vpop.permute.xlu1 %1564 }
 0x3b4   :  { %v1645_v61 = vcombine.low %v1563_v58, %v1565_v20 }
 0x3b6   :  { %v1652_v38 = vrot.slane %v1645_v61, %v2448_v22  ;;  %v1539_v44 = vpop.permute.xlu0 %1538 }
 0x3b7   :  { %v1537_v45 = vpop.permute.xlu1 %1536 }
 0x3b8   :  { %v1680_v47 = vcombine.low %v1643_v51, %v1652_v38  ;;  %v1582_v46 = vcombine.low %v1535_v5, %v1537_v45  ;;  %v2175_v9 = vcombine.high %v1643_v51, %v1652_v38  ;;  %v407_v5 = vcombine.high %v2588_v33, %v2588_v33 }
 0x3ba   :  { %v1543_v2 = vpop.permute.xlu0 %1542  ;;  %v1589_v49 = vrot.slane %v1582_v46, %v2448_v22  ;;  %v1694_v28 = vrot.slane %v1680_v47, %v2401_v31  ;;  %v1738_v43 = vrot.slane %v2175_v9, %v2401_v31  ;;  %v859_v57 = vrot.slane %v407_v5, %v2549_v23  ;;  %v3236_v9 = vld [vmem:[#allocation19_spill] sm:$0xff]  ;;  %v3246_v5 = vld [vmem:[#allocation25_spill] sm:$0xff] }
 0x3bb   :  { %v1541_v6 = vpop.permute.xlu1 %1540 }
 0x3bc   :  { %v1591_v35 = vcombine.low %v1539_v44, %v1541_v6 }
 0x3be   :  { %v1598_v40 = vrot.slane %v1591_v35, %v2448_v22  ;;  %v1551_v27 = vpop.permute.xlu0 %1550 }
 0x3bf   :  { %v1618_v1 = vcombine.low %v1551_v27, %v1553_v55  ;;  %v1545_v3 = vpop.permute.xlu1 %1544 }
 0x3c0   :  { %v1662_v41 = vcombine.low %v1589_v49, %v1598_v40  ;;  %v1600_v18 = vcombine.low %v1543_v2, %v1545_v3  ;;  %v2172_v54 = vcombine.high %v1589_v49, %v1598_v40 }
 0x3c1   :  { %v1625_v14 = vrot.slane %v1618_v1, %v2448_v22 }
 0x3c2   :  { %v1547_v60 = vpop.permute.xlu0 %1546  ;;  %v1607_v19 = vrot.slane %v1600_v18, %v2448_v22  ;;  %v1670_v7 = vrot.slane %v1662_v41, %v2401_v31  ;;  %v1714_v0 = vrot.slane %v2172_v54, %v2401_v31  ;;  %v3237_v18 = vld [vmem:[#allocation13_spill] sm:$0xff]  ;;  %v3241_v54 = vld [vmem:[#allocation15_spill] sm:$0xff] }
 0x3c3   :  { %v1679_v59 = vcombine.low %v1625_v14, %v1634_v63  ;;  %v2174_v42 = vcombine.high %v1625_v14, %v1634_v63  ;;  %v1549_v11 = vpop.permute.xlu1 %1548 }
 0x3c4   :  { %v1609_v15 = vcombine.low %v1547_v60, %v1549_v11  ;;  %v3238_v11 = vld [vmem:[#allocation20_spill] sm:$0xff] }
 0x3c5   :  { %v1687_v17 = vrot.slane %v1679_v59, %v2401_v31  ;;  %v1731_v16 = vrot.slane %v2174_v42, %v2401_v31 }
 0x3c6   :  { %v1616_v21 = vrot.slane %v1609_v15, %v2448_v22 }
 0x3c7   :  { %v1739_v12 = vcombine.low %v1731_v16, %v1738_v43  ;;  %v1695_v32 = vcombine.low %v1687_v17, %v1694_v28  ;;  %v3239_v28 = vld [vmem:[#allocation21_spill] sm:$0xff]  ;;  %v3240_v16 = vld [vmem:[#allocation14_spill] sm:$0xff] }
 0x3c8   :  { %v1663_v10 = vcombine.low %v1607_v19, %v1616_v21  ;;  %v2173_v30 = vcombine.high %v1607_v19, %v1616_v21 }
 0x3c9   :  { %1742 = vrot.lane.b32.xlu0 %v1739_v12, %s2305_s3  ;;  %v3242_v12 = vld [vmem:[#allocation22_spill] sm:$0xff] }
 0x3ca   :  { %v1677_v36 = vrot.slane %v1663_v10, %v2401_v31  ;;  %v1721_v25 = vrot.slane %v2173_v30, %v2401_v31 }
 0x3cc   :  { %v1722_v13 = vcombine.low %v1714_v0, %v1721_v25  ;;  %v1678_v26 = vcombine.low %v1670_v7, %v1677_v36  ;;  %v3243_v0 = vld [vmem:[#allocation23_spill] sm:$0xff] }
 0x3ce   :  { %1740 = vrot.lane.b32.xlu1 %v1722_v13, %s2305_s3  ;;  %v3244_v13 = vld [vmem:[#allocation24_spill] sm:$0xff] }
 0x43b   :  { %v1743_v52 = vpop.permute.xlu0 %1742 }
 0x43c   :  { %v1747_v29 = vsel %vm572_vm3, %v1695_v32, %v1743_v52 }
 0x43d   :  { %2202 = vmatprep.subr.mxu1 %v1747_v29 }
 0x43e   :  { %2203 = vmatpush3.msra.mxu1 %v1747_v29 }
 0x440   :  { %v1741_v24 = vpop.permute.xlu1 %1740 }
 0x441   :  { %v1746_v34 = vsel %vm572_vm3, %v1678_v26, %v1741_v24  ;;  %v3245_v24 = vld [vmem:[#allocation16_spill] sm:$0xff] }
 0x442   :  { %2204 = vmatprep.subr.mxu1 %v1746_v34 }
 0x443   :  { %2205 = vmatpush3.msra.mxu1 %v1746_v34 }
 0x444   :  { %2207 = vmatmul.mubr.msk.f32.vlgmr.msra.gmra.mxu1 %vm572_vm3, %v2612_v48 }
 0x504   :  { %v2208_v55 = vpop.f32.mrf.mxu1 }
 0x505   :  { %1827 = vrot.lane.b32.xlu1 %v2208_v55, %s2306_s2  ;;  %v1897_v4 = vcombine.high %v2208_v55, %v3233_v62  ;;  %v1904_v56 = vrot.slane %v2208_v55, %v2401_v31 }
 0x506   :  { %v1814_v8 = vpop.f32.mrf.mxu1 }
 0x507   :  { %1825 = vrot.lane.b32.xlu0 %v1814_v8, %s2306_s2  ;;  %v1911_v33 = vrot.slane %v1897_v4, %v2401_v31  ;;  %v1831_v20 = vcombine.high %v1814_v8, %v3233_v62  ;;  %v1838_v45 = vrot.slane %v1814_v8, %v2401_v31  ;;  %v3247_v8 = vld [vmem:[#allocation17_spill] sm:$0xff] }
 0x509   :  { %v1845_v53 = vrot.slane %v1831_v20, %v2401_v31 }
 0x50b   :  { %921 = vperm.xlu0 %2222, %v859_v57  }
 0x577   :  { %v1828_v39 = vpop.permute.xlu1 %1827 }
 0x578   :  { %v1912_v58 = vcombine.high %v1828_v39, %v3233_v62  ;;  %v1919_v48 = vrot.slane %v1828_v39, %v2401_v31 }
 0x579   :  { %v1826_v61 = vpop.permute.xlu0 %1825 }
 0x57a   :  { %v1926_v51 = vrot.slane %v1912_v58, %v2401_v31  ;;  %v1927_v38 = vcombine.low %v1904_v56, %v1919_v48  ;;  %v1928_v44 = vcombine.high %v1904_v56, %v1919_v48  ;;  %v1846_v23 = vcombine.high %v1826_v61, %v3233_v62  ;;  %v3248_v58 = vld [vmem:[#allocation18_spill] sm:$0xff] }
 0x57b   :  { %v1853_v47 = vrot.slane %v1826_v61, %v2401_v31  ;;  %v2234_v61 = vld [vmem:[#allocation2] sm:$0x3] }
 0x57c   :  { %v1935_v46 = vrot.slane %v1927_v38, %v2448_v22  ;;  %v1942_v2 = vrot.slane %v1928_v44, %v2448_v22  ;;  %v1943_v6 = vcombine.low %v1911_v33, %v1926_v51  ;;  %v1944_v35 = vcombine.high %v1911_v33, %v1926_v51  ;;  %v3249_v38 = vld [vmem:[#allocation12_spill] sm:$0xff] }
 0x57d   :  { %v1860_v49 = vrot.slane %v1846_v23, %v2401_v31  ;;  %v1861_v40 = vcombine.low %v1838_v45, %v1853_v47  ;;  %v1862_v27 = vcombine.high %v1838_v45, %v1853_v47 }
 0x57e   :  { %v1951_v1 = vrot.slane %v1943_v6, %v2448_v22  ;;  %v1958_v3 = vrot.slane %v1944_v35, %v2448_v22  ;;  %v1959_v41 = vcombine.high %v1935_v46, %v3233_v62  ;;  %v1960_v63 = vcombine.high %v1942_v2, %v3233_v62 }
 0x57f   :  { %v3090_v14 = vadd.f32 %v3236_v9, %v1935_v46  ;;  %v3093_v59 = vadd.f32 %v3237_v18, %v1942_v2  ;;  %v1869_v42 = vrot.slane %v1861_v40, %v2448_v22  ;;  %v1876_v31 = vrot.slane %v1862_v27, %v2448_v22 }
 0x580   :  { %v1961_v60 = vcombine.high %v1951_v1, %v3233_v62  ;;  %v3099_v15 = vadd.f32 %v3238_v11, %v1959_v41  ;;  %v3102_v17 = vadd.f32 %v3239_v28, %v1960_v63  ;;  %v3105_v43 = vadd.f32 %v3240_v16, %v1951_v1 }
 0x581   :  { %v3108_v19 = vadd.f32 %v3241_v54, %v1958_v3  ;;  %2063 = vst.msk [vmem:[#allocation4 + $0x10] sm:$0x3] %vm27_vm2, %v3090_v14  ;;  %2065 = vst.msk [vmem:[#allocation4 + $0x14] sm:$0x3] %vm27_vm2, %v3093_v59  ;;  %v1877_v21 = vcombine.low %v1845_v53, %v1860_v49  ;;  %v1878_v10 = vcombine.high %v1845_v53, %v1860_v49 }
 0x582   :  { %v3115_v32 = vadd.f32 %v3242_v12, %v1961_v60  ;;  %2064 = vst.msk [vmem:[#allocation4 + $0x12] sm:$0x3] %vm27_vm2, %v3099_v15  ;;  %2066 = vst.msk [vmem:[#allocation4 + $0x16] sm:$0x3] %vm27_vm2, %v3102_v17  ;;  %v1893_v7 = vcombine.high %v1869_v42, %v3233_v62  ;;  %v1894_v36 = vcombine.high %v1876_v31, %v3233_v62 }
 0x583   :  { %2067 = vst.msk [vmem:[#allocation4 + $0x18] sm:$0x3] %vm27_vm2, %v3105_v43  ;;  %2069 = vst.msk [vmem:[#allocation4 + $0x1c] sm:$0x3] %vm27_vm2, %v3108_v19  ;;  %v1885_v30 = vrot.slane %v1877_v21, %v2448_v22  ;;  %v2011_v25 = vadd.f32 %v3243_v0, %v1869_v42  ;;  %v2013_v26 = vadd.f32 %v3244_v13, %v1876_v31  ;;  %v3250_v42 = vld [vmem:[#allocation11_spill] sm:$0xff] }
 0x584   :  { %2068 = vst.msk [vmem:[#allocation4 + $0x1a] sm:$0x3] %vm27_vm2, %v3115_v32  ;;  %v1892_v52 = vrot.slane %v1878_v10, %v2448_v22  ;;  %v2012_v34 = vadd.f32 %v3245_v24, %v1893_v7  ;;  %v2014_v57 = vadd.f32 %v3247_v8, %v1894_v36  ;;  %v1962_v6 = vcombine.high %v1958_v3, %v3233_v62 }
 0x585   :  { %v1895_v29 = vcombine.high %v1885_v30, %v3233_v62  ;;  %v2015_v55 = vadd.f32 %v3246_v5, %v1885_v30  ;;  %2055 = vst.msk [vmem:[#allocation4] sm:$0x3] %vm27_vm2, %v2011_v25  ;;  %2057 = vst.msk [vmem:[#allocation4 + $0x4] sm:$0x3] %vm27_vm2, %v2013_v26  ;;  %v2072_v4 = vsel %vm27_vm2, %v2011_v25, 0.0  ;;  %v2075_v23 = vsel %vm27_vm2, %v2013_v26, 0.0 }
 0x586   :  { %v922_v39 = vpop.permute.xlu0 %921  ;;  %v1896_v56 = vcombine.high %v1892_v52, %v3233_v62  ;;  %v2017_v22 = vadd.f32 %v2899_v50, %v1892_v52  ;;  %2056 = vst.msk [vmem:[#allocation4 + $0x2] sm:$0x3] %vm27_vm2, %v2012_v34  ;;  %v2073_v33 = vsel %vm27_vm2, %v2012_v34, 0.0  ;;  %2058 = vst.msk [vmem:[#allocation4 + $0x6] sm:$0x3] %vm27_vm2, %v2014_v57  ;;  %v2077_v2 = vsel %vm27_vm2, %v2014_v57, 0.0 }
 0x587   :  { %v2016_v48 = vadd.f32 %v3248_v58, %v1895_v29  ;;  %2059 = vst.msk [vmem:[#allocation4 + $0x8] sm:$0x3] %vm27_vm2, %v2015_v55  ;;  %v2074_v20 = vadd.f32 %v2073_v33, %v2072_v4  ;;  %v954_v51 = vmul.f32 %v2234_v61, %v922_v39  ;;  %v2235_v50 = vld [vmem:[#allocation2 + $0x2] sm:$0x3]  ;;  %v795_v49 = vcombine.high %v2813_v37, %v3233_v62 }
 0x588   :  { %v2018_v44 = vadd.f32 %v3249_v38, %v1896_v56  ;;  %2061 = vst.msk [vmem:[#allocation4 + $0xc] sm:$0x3] %vm27_vm2, %v2017_v22  ;;  %v955_v45 = vmul.f32 %v2235_v50, %v922_v39  ;;  %v2079_v27 = vsel %vm27_vm2, %v2015_v55, 0.0 }
 0x589   :  { %2060 = vst.msk [vmem:[#allocation4 + $0xa] sm:$0x3] %vm27_vm2, %v2016_v48  ;;  %v2076_v47 = vadd.f32 %v2075_v23, %v2074_v20  ;;  %v1993_v46 = vrot.slane %v954_v51, 1  ;;  %v2081_v18 = vsel %vm27_vm2, %v2016_v48, 0.0 }
 0x58a   :  { %2062 = vst.msk [vmem:[#allocation4 + $0xe] sm:$0x3] %vm27_vm2, %v2018_v44  ;;  %v1019_v35 = vrot.slane %v955_v45, 7 }
 0x58b   :  { %v2078_v53 = vadd.f32 %v2077_v2, %v2076_v47  ;;  %v1994_v40 = vsel %vm989_vm4, %v955_v45, %v1993_v46 }
 0x58c   :  { %v1020_v1 = vsel %vm989_vm4, %v1019_v35, %v954_v51  ;;  %v2026_v41 = vadd.f32 %v1994_v40, %v1962_v6 }
 0x58d   :  { %v2080_v63 = vadd.f32 %v2079_v27, %v2078_v53  ;;  %v1052_v9 = vadd.f32 %v1020_v1, %v795_v49 }
 0x58e   :  { %v2034_v31 = vrot.slane %v2026_v41, %v3250_v42  ;;  %2070 = vst.msk [vmem:[#allocation4 + $0x1e] sm:$0x3] %vm27_vm2, %v2026_v41 }
 0x58f   :  { %v2082_v3 = vadd.f32 %v2081_v18, %v2080_v63  ;;  %v1060_v62 = vrot.slane %v1052_v9, %v3250_v42 }
 0x590   :  { %2247 = shalt.err (!%p2244_p4)
}
 0x591   :  { %s2308_s15 = smov 32   ;;  %s2309_s16 = smov 2   ;;  %v2083_v37 = vsel %vm27_vm2, %v2017_v22, 0.0  ;;  %v2035_v60 = vcombine.high %v2034_v31, %v2034_v31  ;;  %v2042_v11 = vrot.slane %v2034_v31, %v3250_v42  ;;  %v1061_v16 = vcombine.high %v1060_v62, %v1060_v62 }
 0x592   :  { %2126 = dma.vmem_to_hbm [thread:$0]  %s2121_s13, 512, %s3211_s4, [#allocation5], %s2308_s15, %s2308_s15, %s2309_s16   ;;  %v2084_v28 = vadd.f32 %v2083_v37, %v2082_v3  ;;  %v1068_v54 = vrot.slane %v1060_v62, %v3250_v42  ;;  %v2085_v21 = vsel %vm27_vm2, %v2018_v44, 0.0  ;;  %v2087_v7 = vsel %vm27_vm2, %v3090_v14, 0.0 }
 0x593   :  { %v2049_v12 = vrot.slane %v2035_v60, %v3250_v42  ;;  %2052 = vst.msk [vmem:[#allocation2 + $0x1] sm:$0x1] %vm1078_vm8, %v2042_v11  ;;  %v1075_v30 = vrot.slane %v1061_v16, %v3250_v42  ;;  %v2089_v0 = vsel %vm27_vm2, %v3099_v15, 0.0  ;;  %v2091_v13 = vsel %vm27_vm2, %v3093_v59, 0.0  ;;  %s2310_s4 = smov [#allocation6]   ;;  %s2311_s20 = smov [#allocation8]  }
 0x594   :  { %v2086_v10 = vadd.f32 %v2085_v21, %v2084_v28  ;;  %1079 = vst.msk [vmem:[#allocation2] sm:$0x1] %vm1078_vm8, %v1068_v54  ;;  %v2093_v52 = vsel %vm27_vm2, %v3102_v17, 0.0  ;;  %v2095_v14 = vsel %vm27_vm2, %v3105_v43, 0.0  ;;  %v2097_v15 = vsel %vm27_vm2, %v3115_v32, 0.0  ;;  %s2133_s19 = sshll.u32 %s2310_s4, 4  ;;  %s2134_s19 = int_to_ptr.vmem [resolvable:$true] %s2133_s19 }
 0x595   :  { %2053 = vst.msk [vmem:[#allocation2 + $0x3] sm:$0x1] %vm1078_vm8, %v2049_v12  ;;  %1080 = vst.msk [vmem:[#allocation2 + $0x2] sm:$0x1] %vm1078_vm8, %v1075_v30  ;;  %v2099_v59 = vsel %vm27_vm2, %v3108_v19, 0.0  ;;  %v2101_v57 = vsel %vm27_vm2, %v2026_v41, 0.0  ;;  %p2261_p6 = scmp.lt.s32.totalorder %s2134_s19, %s2134_s19 }
 0x596   :  { %v2088_v36 = vadd.f32 %v2087_v7, %v2086_v10  ;;  %v2071_v17 = vld [vmem:[#allocation3] sm:$0x3]  ;;  %s2142_s21 = sshll.u32 %s2311_s20, 4  ;;  %s2256_s22 = scalar_lea.vmem %s2134_s19, 32  ;;  %s2143_s21 = int_to_ptr.vmem [resolvable:$true] %s2142_s21 }
 0x597   :  { %p2257_p5 = scmp.ne.s32.totalorder %s2134_s19, %s2256_s22  ;;  %p2262_p7 = scmp.lt.s32.totalorder %s2256_s22, %s2256_s22 }
 0x598   :  { %v2090_v25 = vadd.f32 %v2089_v0, %v2088_v36 }
 0x599   :  { %p2263_p8 = por %p2262_p7, %p2261_p6 }
 0x59a   :  { %v2092_v26 = vadd.f32 %v2091_v13, %v2090_v25 }
 0x59b   :  { %v2111_v29 = vld [vmem:[#allocation2] sm:$0x3]  ;;  %p2264_p9 = pnand %p2263_p8, %p2257_p5 }
 0x59c   :  { %v2094_v24 = vadd.f32 %v2093_v52, %v2092_v26  ;;  %2113 = vst.msk [vmem:[#allocation8] sm:$0x3] %vm27_vm2, %v2111_v29  ;;  %v2112_v34 = vld [vmem:[#allocation2 + $0x2] sm:$0x3] }
 0x59d   :  { %2114 = vst.msk [vmem:[#allocation8 + $0x2] sm:$0x3] %vm27_vm2, %v2112_v34 }
 0x59e   :  { %v2096_v5 = vadd.f32 %v2095_v14, %v2094_v24 }
 0x5a0   :  { %v2098_v55 = vadd.f32 %v2097_v15, %v2096_v5 }
 0x5a2   :  { %v2100_v8 = vadd.f32 %v2099_v59, %v2098_v55 }
 0x5a4   :  { %v2102_v4 = vadd.f32 %v2101_v57, %v2100_v8 }
 0x5a6   :  { %v2103_v39 = vadd.f32 %v2102_v4, %v2071_v17 }
 0x5a8   :  { %2104 = vst.msk [vmem:[#allocation3] sm:$0x3] %vm27_vm2, %v2103_v39 }
 0x5af   :  { %v2108_v43 = vld [vmem:[#allocation3] sm:$0x3] }
 0x5b0   :  { %v2109_v56 = vmul.f32 0.0625, %v2108_v43 }
 0x5b2   :  { %2110 = vst.msk [vmem:[#allocation6] sm:$0x3] %vm27_vm2, %v2109_v56 }
 0x5b3   :  { %2267 = shalt.err (!%p2264_p9)
}
 0x5b4   :  { %2136 = dma.vmem_to_hbm [thread:$0]  %s2134_s19, 32, %s3212_s5, [#allocation7]  }
 0x5b5   :  { %s2276_s25 = scalar_lea.vmem %s2143_s21, 64  ;;  %p2281_p11 = scmp.lt.s32.totalorder %s2143_s21, %s2143_s21 }
 0x5b6   :  { %p2277_p10 = scmp.ne.s32.totalorder %s2143_s21, %s2276_s25  ;;  %p2282_p12 = scmp.lt.s32.totalorder %s2276_s25, %s2276_s25 }
 0x5b8   :  { %p2283_p13 = por %p2282_p12, %p2281_p11 }
 0x5ba   :  { %p2284_p0 = pnand %p2283_p13, %p2277_p10 }
 0x5bc   :  { %2287 = shalt.err (!%p2284_p0)
}
 0x5bd   :  { %2148 = dma.vmem_to_hbm [thread:$0]  %s2143_s21, 64, %s3213_s6, [#allocation7], %s2308_s15, %s2308_s15, %s2309_s16  }
 0x5be   :  { %2296 = dma.done.wait [#allocation5], 512  }
 0x5bf   :  { %2297 = vsyncadd [#allocation5], 4294966784 }
 0x5c0   :  { %2298 = dma.done.wait [#allocation7], 96  }
 0x5c1   :  { %2299 = vsyncadd [#allocation7], 4294967200 }
 0x5c2   :  { %2158 = vsyncpa [#allocation5], 1 }
 0x5c3   :  { %2159 = vsyncpa [#allocation7], 1 }

</bundles_post_ra>
